<compile_context>
chip_gen: v7x
topology: tpu7x:2x2x1
jax: 0.10.0
libtpu: 0.0.40
codegen_flags: <defaults>
</compile_context>

<pallas_src>
import functools
import numpy as np
import jax
import jax.numpy as jnp
from jax.experimental import pallas as pl
from jax.experimental.pallas import tpu as pltpu

EDGE_Z = 1            # as in the reference mousenet config
LANE = 128            # channels-last padded width carried between edges
TILE_M = 512          # row-block size for the 1-D matmul grid

# (source, target, in_ch, out_ch, spatial_kernel, spatial_stride, spatial_pad, gsh, gsw)
# Order is the nx.edge_bfs order from the 'input' root of the synthetic graph.
NETWORK_EDGES = [
    ("input",   "LGNd",    3,  8, 3, 1, 1, 0.8, 1.5),
    ("LGNd",    "VISp4",   8,  8, 3, 1, 1, 0.8, 1.5),
    ("VISp4",   "VISp2/3", 8,  8, 3, 1, 1, 0.8, 1.5),
    ("VISp4",   "VISp5",   8, 16, 3, 1, 1, 0.8, 1.5),
    ("VISp2/3", "VISp5",   8, 16, 3, 1, 1, 0.8, 1.5),   # residual add into VISp5
    ("VISp2/3", "VISl5",   8,  8, 3, 2, 1, 0.8, 1.5),   # stride-2 branch
]
OUTPUT_AREAS = ["VISp5", "VISl5"]
TEMPORAL_KERNEL, TEMPORAL_PAD = 3, 1
AREA_CHANNELS = {dst: cout for (_s, dst, _ci, cout, *_r) in NETWORK_EDGES}


def _round_up(x, m):
    return (x + m - 1) // m * m


# ----------------------------- Pallas kernel ---------------------------------

def _conv_epilogue_kernel(p_ref, w_ref, shift_ref, o_ref, *, apply_relu):
    # Full-K / full-N block: one matmul per grid step, no accumulator scratch.
    y = jnp.dot(p_ref[...], w_ref[...], preferred_element_type=jnp.float32)
    y = y + shift_ref[0:1, :]                       # bias + folded BN shift
    if apply_relu:
        y = jnp.maximum(y, 0.0)
    o_ref[...] = y


def fused_conv_matmul(patches, weight_kn, shift, apply_relu):
    """(M, Kp) @ (Kp, LANE) with fused per-column shift and optional ReLU.

    patches/weight are bf16, accumulation and epilogue are f32.  1-D grid over M.
    """
    M, Kp = patches.shape
    Np = weight_kn.shape[1]
    # Row block: 512 for large M, otherwise split into >=2 blocks so both
    # TensorCores on v7x get work.  (For the test shapes: 2048->4x512, 512->2x256.)
    if M > TILE_M:
        bm = TILE_M
    else:
        bm = max(8, _round_up(max(M // 2, 1), 8))
    bm = min(bm, _round_up(M, 8))
    Mp = _round_up(M, bm)
    if Mp != M:
        patches = jnp.pad(patches, ((0, Mp - M), (0, 0)))

    grid = (Mp // bm,)
    out = pl.pallas_call(
        functools.partial(_conv_epilogue_kernel, apply_relu=apply_relu),
        out_shape=jax.ShapeDtypeStruct((Mp, Np), jnp.float32),
        grid_spec=pltpu.PrefetchScalarGridSpec(
            num_scalar_prefetch=0,
            grid=grid,
            in_specs=[
                pl.BlockSpec((bm, Kp), lambda i: (i, 0)),     # patches row-block
                pl.BlockSpec((Kp, Np), lambda i: (0, 0)),     # full weight, DMA'd once
                pl.BlockSpec((8, Np), lambda i: (0, 0)),      # resident shift block
            ],
            out_specs=pl.BlockSpec((bm, Np), lambda i: (i, 0)),
        ),
        compiler_params=pltpu.CompilerParams(
            dimension_semantics=("parallel",)),
    )(patches, weight_kn, shift)
    return out[:M] if Mp != M else out


# ----------------------------- conv glue --------------------------------------

def im2col_3d_cl(x_cl, cin, ksize, stride, padding, kp):
    """Channels-last im2col.

    x_cl: (B, T, H, W, Cp) channels-last activation (real channels in [:cin]).
    Returns bf16 patches (B*To*Ho*Wo, kp) with K order = (kt, kh, kw, cin) and
    zero fill up to kp, built with a single concatenate (no transposes, no
    separate full-array pad), plus the output spatial dims.
    """
    B, T, H, W, _ = x_cl.shape
    kt, kh, kw = ksize
    st, sh, sw = stride
    pt, ph, pw = padding
    xs = x_cl[..., :cin].astype(jnp.bfloat16)
    xp = jnp.pad(xs, ((0, 0), (pt, pt), (ph, ph), (pw, pw), (0, 0)))
    To = (T + 2 * pt - kt) // st + 1
    Ho = (H + 2 * ph - kh) // sh + 1
    Wo = (W + 2 * pw - kw) // sw + 1
    taps = []
    for dt in range(kt):
        for dh in range(kh):
            for dw in range(kw):
                taps.append(xp[:,
                               dt:dt + st * To:st,
                               dh:dh + sh * Ho:sh,
                               dw:dw + sw * Wo:sw, :])
    K = kt * kh * kw * cin
    if kp > K:
        taps.append(jnp.zeros((B, To, Ho, Wo, kp - K), jnp.bfloat16))
    p = jnp.concatenate(taps, axis=-1).reshape(B * To * Ho * Wo, kp)
    return p, (To, Ho, Wo)


def conv3d_bn_relu_cl(x_cl, arrays, cin, cout, ksize, stride, padding,
                      apply_relu=True, do_bn=True):
    """Masked Conv3d (+ eval-mode BN affine) (+ ReLU) on channels-last input.

    Returns the channels-last, 128-lane-padded activation (B, To, Ho, Wo, LANE);
    padded channels are exactly zero (zero weight columns, zero shift).
    """
    B = x_cl.shape[0]
    kt, kh, kw = ksize
    K = cin * kt * kh * kw
    Kp = _round_up(K, 128)
    patches, (To, Ho, Wo) = im2col_3d_cl(x_cl, cin, ksize, stride, padding, Kp)

    # weight (cout, cin, kt, kh, kw) -> K-order (kt, kh, kw, cin) -> (K, cout)
    w_kn = jnp.transpose(arrays["weight"], (2, 3, 4, 1, 0)).reshape(K, cout)
    if do_bn:
        eps = 1e-5
        scale = arrays["gamma"] / jnp.sqrt(arrays["var"] + eps)
        shift = (arrays["bias"] - arrays["mean"]) * scale + arrays["beta"]
        w_kn = w_kn * scale[None, :]          # fold BN scale into the weight
    else:
        shift = arrays["bias"]

    # pad K / N on the tiny weight and shift only (never the big patches array)
    w_kn = jnp.pad(w_kn, ((0, Kp - K), (0, LANE - cout))).astype(jnp.bfloat16)
    shift_pad = jnp.pad(shift[None, :].astype(jnp.float32),
                        ((0, 7), (0, LANE - cout)))

    out = fused_conv_matmul(patches, w_kn, shift_pad, apply_relu)
    return out.reshape(B, To, Ho, Wo, LANE)   # lane-dense channels-last layout


# ----------------------------- parameter setup --------------------------------

def make_gaussian_kernel_mask_3d(rng, peak, sigma):
    width = int(sigma * EDGE_Z)
    x = np.arange(-width, width + 1)
    z = np.arange(-1, 2)
    Z, X, Y = np.meshgrid(x, z, x)
    radius = np.sqrt(Z ** 2 + X ** 2 + Y ** 2)
    probability = peak * np.exp(-radius ** 2 / 2 / sigma ** 2)
    return (rng.random(probability.shape) < probability).astype(np.float32)


def make_gaussian_kernel_mask_vary_channel_3d(rng, peak, sigma, kernel_size,
                                              out_channels, in_channels):
    re = np.zeros((out_channels, in_channels, *kernel_size), dtype=np.float32)
    for i in range(out_channels):
        for j in range(in_channels):
            re[i, j] = make_gaussian_kernel_mask_3d(rng, peak, sigma)
    return re


def init_params(seed=0):
    rng = np.random.default_rng(seed)
    key = jax.random.PRNGKey(seed)
    params = {}
    for (src, dst, cin, cout, k, _s, _p, gsh, gsw) in NETWORK_EDGES:
        key, wk, bk = jax.random.split(key, 3)
        kt = TEMPORAL_KERNEL
        fan_in = cin * kt * k * k
        bound = float(1.0 / np.sqrt(fan_in))
        w = jax.random.uniform(wk, (cout, cin, kt, k, k), jnp.float32, -bound, bound)
        mask = jnp.asarray(
            make_gaussian_kernel_mask_vary_channel_3d(rng, gsh, gsw, (kt, k, k), cout, cin))
        params[src + dst] = dict(
            weight=w * mask,                                   # Conv3dMask: weight = weight * mask
            bias=jax.random.uniform(bk, (cout,), jnp.float32, -bound, bound),
            gamma=jnp.ones((cout,), jnp.float32),
            beta=jnp.zeros((cout,), jnp.float32),
            mean=jnp.zeros((cout,), jnp.float32),
            var=jnp.ones((cout,), jnp.float32),
        )
    # VISp5 downsampler: Conv3d(visp_out, 32, 1, stride=(1,2,2)), no mask / BN / ReLU
    key, wk, bk = jax.random.split(key, 3)
    cin, cout = 16, 32
    bound = float(1.0 / np.sqrt(cin))
    params["visp5_downsampler"] = dict(
        weight=jax.random.uniform(wk, (cout, cin, 1, 1, 1), jnp.float32, -bound, bound),
        bias=jax.random.uniform(bk, (cout,), jnp.float32, -bound, bound),
    )
    return params


# ----------------------------- MouseNet_3d forward ----------------------------

def mousenet_3d_forward(params, x):
    """x: (BN, C, SL, H, W) -> concatenated OUTPUT_AREAS activations (channel axis)."""
    # NCTHW -> channels-last once at the boundary.
    x_cl = jnp.transpose(x, (0, 2, 3, 4, 1))
    calc_graph = {}
    for (src, dst, cin, cout, k, s, p, _gsh, _gsw) in NETWORK_EDGES:
        arrays = params[src + dst]
        inp = x_cl if src == "input" else calc_graph[src]
        y = conv3d_bn_relu_cl(inp, arrays, cin, cout,
                              ksize=(TEMPORAL_KERNEL, k, k),
                              stride=(1, s, s),
                              padding=(TEMPORAL_PAD, p, p),
                              apply_relu=True, do_bn=True)
        if dst in calc_graph:
            calc_graph[dst] = calc_graph[dst] + y            # residual accumulation
        else:
            calc_graph[dst] = y

    re = None
    for area in OUTPUT_AREAS:
        if area == "VISp5":
            ds = conv3d_bn_relu_cl(calc_graph["VISp5"], params["visp5_downsampler"],
                                   cin=16, cout=32, ksize=(1, 1, 1),
                                   stride=(1, 2, 2), padding=(0, 0, 0),
                                   apply_relu=False, do_bn=False)
            re = ds[..., :32]
        elif re is not None:
            re = jnp.concatenate([calc_graph[area][..., :AREA_CHANNELS[area]], re], axis=-1)
        else:
            re = calc_graph[area][..., :AREA_CHANNELS[area]]
    # Back to NCTHW once at the end to match the PyTorch module output convention.
    return jnp.transpose(re, (0, 4, 1, 2, 3))


if __name__ == "__main__":
    params = init_params(0)
    x = jax.random.normal(jax.random.PRNGKey(0), (2, 3, 4, 16, 16), jnp.float32)
    forward = jax.jit(mousenet_3d_forward)
    out = forward(params, x)
    out = jax.block_until_ready(out)
    assert out.shape == (2, 8 + 32, 4, 8, 8), out.shape
    assert bool(jnp.all(jnp.isfinite(out)))
    print("KERNEL_OK")
</pallas_src>

<mosaic_0001>
module attributes {stable_mosaic.version = 11 : i64} {
  func.func @_conv_epilogue_kernel(%arg0: i32, %arg1: memref<512x128xbf16, #tpu.memory_space<vmem>>, %arg2: memref<128x128xbf16, #tpu.memory_space<vmem>>, %arg3: memref<8x128xf32, #tpu.memory_space<vmem>>, %arg4: memref<512x128xf32, #tpu.memory_space<vmem>>) attributes {dimension_semantics = [#tpu.dimension_semantics<parallel>], iteration_bounds = array<i64: 4>, scalar_prefetch = 0 : i64, scratch_operands = 0 : i64, tpu.core_type = #tpu.core_type<tc>, window_params = [{transform_indices = @transform_0, window_bounds = array<i64: 512, 128>}, {pipeline_mode = #tpu.pipeline_mode<synchronous>, transform_indices = @transform_1, window_bounds = array<i64: 128, 128>}, {pipeline_mode = #tpu.pipeline_mode<synchronous>, transform_indices = @transform_2, window_bounds = array<i64: 8, 128>}, {transform_indices = @transform_3, window_bounds = array<i64: 512, 128>}]} {
    %c0 = arith.constant 0 : index
    %c0_0 = arith.constant 0 : index
    %0 = vector.load %arg1[%c0, %c0_0] : memref<512x128xbf16, #tpu.memory_space<vmem>>, vector<512x128xbf16>
    %c0_1 = arith.constant 0 : index
    %c0_2 = arith.constant 0 : index
    %1 = vector.load %arg2[%c0_1, %c0_2] : memref<128x128xbf16, #tpu.memory_space<vmem>>, vector<128x128xbf16>
    %cst = arith.constant dense<0.000000e+00> : vector<512x128xf32>
    %2 = tpu.matmul %0, %1, %cst {dimension_numbers = #tpu.dot_dimension_numbers<[1], [0], [0], [1], [0, 0, 1, 1], [], []>} : vector<512x128xbf16>, vector<128x128xbf16>, vector<512x128xf32> -> vector<512x128xf32>
    %c0_3 = arith.constant 0 : index
    %c0_4 = arith.constant 0 : index
    %3 = vector.load %arg3[%c0_3, %c0_4] : memref<8x128xf32, #tpu.memory_space<vmem>>, vector<1x128xf32>
    %4 = vector.broadcast %3 : vector<1x128xf32> to vector<512x128xf32>
    %5 = arith.addf %2, %4 : vector<512x128xf32>
    %cst_5 = arith.constant 0.000000e+00 : f32
    %6 = vector.broadcast %cst_5 : f32 to vector<512x128xf32>
    %7 = arith.maximumf %5, %6 : vector<512x128xf32>
    %c0_6 = arith.constant 0 : index
    %c0_7 = arith.constant 0 : index
    %8 = vector.load %arg4[%c0_6, %c0_7] : memref<512x128xf32, #tpu.memory_space<vmem>>, vector<512x128xf32>
    tpu.vector_store %arg4[%c0_6, %c0_7], %7 {strides = array<i32>} : memref<512x128xf32, #tpu.memory_space<vmem>>, vector<512x128xf32>,
    return
  }
  func.func @transform_0(%arg0: i32) -> (i32, i32) {
    %c0_i32 = arith.constant 0 : i32
    %c0_i32_0 = arith.constant 0 : i32
    return %arg0, %c0_i32 : i32, i32
  }
  func.func @transform_1(%arg0: i32) -> (i32, i32) {
    %c0_i32 = arith.constant 0 : i32
    %c0_i32_0 = arith.constant 0 : i32
    %c0_i32_1 = arith.constant 0 : i32
    return %c0_i32, %c0_i32_0 : i32, i32
  }
  func.func @transform_2(%arg0: i32) -> (i32, i32) {
    %c0_i32 = arith.constant 0 : i32
    %c0_i32_0 = arith.constant 0 : i32
    %c0_i32_1 = arith.constant 0 : i32
    return %c0_i32, %c0_i32_0 : i32, i32
  }
  func.func @transform_3(%arg0: i32) -> (i32, i32) {
    %c0_i32 = arith.constant 0 : i32
    %c0_i32_0 = arith.constant 0 : i32
    return %arg0, %c0_i32 : i32, i32
  }
}

module attributes {stable_mosaic.version = 11 : i64} {
  func.func @_conv_epilogue_kernel(%arg0: i32, %arg1: memref<512x256xbf16, #tpu.memory_space<vmem>>, %arg2: memref<256x128xbf16, #tpu.memory_space<vmem>>, %arg3: memref<8x128xf32, #tpu.memory_space<vmem>>, %arg4: memref<512x128xf32, #tpu.memory_space<vmem>>) attributes {dimension_semantics = [#tpu.dimension_semantics<parallel>], iteration_bounds = array<i64: 4>, scalar_prefetch = 0 : i64, scratch_operands = 0 : i64, tpu.core_type = #tpu.core_type<tc>, window_params = [{transform_indices = @transform_0, window_bounds = array<i64: 512, 256>}, {pipeline_mode = #tpu.pipeline_mode<synchronous>, transform_indices = @transform_1, window_bounds = array<i64: 256, 128>}, {pipeline_mode = #tpu.pipeline_mode<synchronous>, transform_indices = @transform_2, window_bounds = array<i64: 8, 128>}, {transform_indices = @transform_3, window_bounds = array<i64: 512, 128>}]} {
    %c0 = arith.constant 0 : index
    %c0_0 = arith.constant 0 : index
    %0 = vector.load %arg1[%c0, %c0_0] : memref<512x256xbf16, #tpu.memory_space<vmem>>, vector<512x256xbf16>
    %c0_1 = arith.constant 0 : index
    %c0_2 = arith.constant 0 : index
    %1 = vector.load %arg2[%c0_1, %c0_2] : memref<256x128xbf16, #tpu.memory_space<vmem>>, vector<256x128xbf16>
    %cst = arith.constant dense<0.000000e+00> : vector<512x128xf32>
    %2 = tpu.matmul %0, %1, %cst {dimension_numbers = #tpu.dot_dimension_numbers<[1], [0], [0], [1], [0, 0, 1, 1], [], []>} : vector<512x256xbf16>, vector<256x128xbf16>, vector<512x128xf32> -> vector<512x128xf32>
    %c0_3 = arith.constant 0 : index
    %c0_4 = arith.constant 0 : index
    %3 = vector.load %arg3[%c0_3, %c0_4] : memref<8x128xf32, #tpu.memory_space<vmem>>, vector<1x128xf32>
    %4 = vector.broadcast %3 : vector<1x128xf32> to vector<512x128xf32>
    %5 = arith.addf %2, %4 : vector<512x128xf32>
    %cst_5 = arith.constant 0.000000e+00 : f32
    %6 = vector.broadcast %cst_5 : f32 to vector<512x128xf32>
    %7 = arith.maximumf %5, %6 : vector<512x128xf32>
    %c0_6 = arith.constant 0 : index
    %c0_7 = arith.constant 0 : index
    %8 = vector.load %arg4[%c0_6, %c0_7] : memref<512x128xf32, #tpu.memory_space<vmem>>, vector<512x128xf32>
    tpu.vector_store %arg4[%c0_6, %c0_7], %7 {strides = array<i32>} : memref<512x128xf32, #tpu.memory_space<vmem>>, vector<512x128xf32>,
    return
  }
  func.func @transform_0(%arg0: i32) -> (i32, i32) {
    %c0_i32 = arith.constant 0 : i32
    %c0_i32_0 = arith.constant 0 : i32
    return %arg0, %c0_i32 : i32, i32
  }
  func.func @transform_1(%arg0: i32) -> (i32, i32) {
    %c0_i32 = arith.constant 0 : i32
    %c0_i32_0 = arith.constant 0 : i32
    %c0_i32_1 = arith.constant 0 : i32
    return %c0_i32, %c0_i32_0 : i32, i32
  }
  func.func @transform_2(%arg0: i32) -> (i32, i32) {
    %c0_i32 = arith.constant 0 : i32
    %c0_i32_0 = arith.constant 0 : i32
    %c0_i32_1 = arith.constant 0 : i32
    return %c0_i32, %c0_i32_0 : i32, i32
  }
  func.func @transform_3(%arg0: i32) -> (i32, i32) {
    %c0_i32 = arith.constant 0 : i32
    %c0_i32_0 = arith.constant 0 : i32
    return %arg0, %c0_i32 : i32, i32
  }
}

module attributes {stable_mosaic.version = 11 : i64} {
  func.func @_conv_epilogue_kernel(%arg0: i32, %arg1: memref<256x128xbf16, #tpu.memory_space<vmem>>, %arg2: memref<128x128xbf16, #tpu.memory_space<vmem>>, %arg3: memref<8x128xf32, #tpu.memory_space<vmem>>, %arg4: memref<256x128xf32, #tpu.memory_space<vmem>>) attributes {dimension_semantics = [#tpu.dimension_semantics<parallel>], iteration_bounds = array<i64: 2>, scalar_prefetch = 0 : i64, scratch_operands = 0 : i64, tpu.core_type = #tpu.core_type<tc>, window_params = [{transform_indices = @transform_0, window_bounds = array<i64: 256, 128>}, {pipeline_mode = #tpu.pipeline_mode<synchronous>, transform_indices = @transform_1, window_bounds = array<i64: 128, 128>}, {pipeline_mode = #tpu.pipeline_mode<synchronous>, transform_indices = @transform_2, window_bounds = array<i64: 8, 128>}, {transform_indices = @transform_3, window_bounds = array<i64: 256, 128>}]} {
    %c0 = arith.constant 0 : index
    %c0_0 = arith.constant 0 : index
    %0 = vector.load %arg1[%c0, %c0_0] : memref<256x128xbf16, #tpu.memory_space<vmem>>, vector<256x128xbf16>
    %c0_1 = arith.constant 0 : index
    %c0_2 = arith.constant 0 : index
    %1 = vector.load %arg2[%c0_1, %c0_2] : memref<128x128xbf16, #tpu.memory_space<vmem>>, vector<128x128xbf16>
    %cst = arith.constant dense<0.000000e+00> : vector<256x128xf32>
    %2 = tpu.matmul %0, %1, %cst {dimension_numbers = #tpu.dot_dimension_numbers<[1], [0], [0], [1], [0, 0, 1, 1], [], []>} : vector<256x128xbf16>, vector<128x128xbf16>, vector<256x128xf32> -> vector<256x128xf32>
    %c0_3 = arith.constant 0 : index
    %c0_4 = arith.constant 0 : index
    %3 = vector.load %arg3[%c0_3, %c0_4] : memref<8x128xf32, #tpu.memory_space<vmem>>, vector<1x128xf32>
    %4 = vector.broadcast %3 : vector<1x128xf32> to vector<256x128xf32>
    %5 = arith.addf %2, %4 : vector<256x128xf32>
    %c0_5 = arith.constant 0 : index
    %c0_6 = arith.constant 0 : index
    %6 = vector.load %arg4[%c0_5, %c0_6] : memref<256x128xf32, #tpu.memory_space<vmem>>, vector<256x128xf32>
    tpu.vector_store %arg4[%c0_5, %c0_6], %5 {strides = array<i32>} : memref<256x128xf32, #tpu.memory_space<vmem>>, vector<256x128xf32>,
    return
  }
  func.func @transform_0(%arg0: i32) -> (i32, i32) {
    %c0_i32 = arith.constant 0 : i32
    %c0_i32_0 = arith.constant 0 : i32
    return %arg0, %c0_i32 : i32, i32
  }
  func.func @transform_1(%arg0: i32) -> (i32, i32) {
    %c0_i32 = arith.constant 0 : i32
    %c0_i32_0 = arith.constant 0 : i32
    %c0_i32_1 = arith.constant 0 : i32
    return %c0_i32, %c0_i32_0 : i32, i32
  }
  func.func @transform_2(%arg0: i32) -> (i32, i32) {
    %c0_i32 = arith.constant 0 : i32
    %c0_i32_0 = arith.constant 0 : i32
    %c0_i32_1 = arith.constant 0 : i32
    return %c0_i32, %c0_i32_0 : i32, i32
  }
  func.func @transform_3(%arg0: i32) -> (i32, i32) {
    %c0_i32 = arith.constant 0 : i32
    %c0_i32_0 = arith.constant 0 : i32
    return %arg0, %c0_i32 : i32, i32
  }
}

module attributes {stable_mosaic.version = 11 : i64} {
  func.func @_conv_epilogue_kernel(%arg0: i32, %arg1: memref<256x256xbf16, #tpu.memory_space<vmem>>, %arg2: memref<256x128xbf16, #tpu.memory_space<vmem>>, %arg3: memref<8x128xf32, #tpu.memory_space<vmem>>, %arg4: memref<256x128xf32, #tpu.memory_space<vmem>>) attributes {dimension_semantics = [#tpu.dimension_semantics<parallel>], iteration_bounds = array<i64: 2>, scalar_prefetch = 0 : i64, scratch_operands = 0 : i64, tpu.core_type = #tpu.core_type<tc>, window_params = [{transform_indices = @transform_0, window_bounds = array<i64: 256, 256>}, {pipeline_mode = #tpu.pipeline_mode<synchronous>, transform_indices = @transform_1, window_bounds = array<i64: 256, 128>}, {pipeline_mode = #tpu.pipeline_mode<synchronous>, transform_indices = @transform_2, window_bounds = array<i64: 8, 128>}, {transform_indices = @transform_3, window_bounds = array<i64: 256, 128>}]} {
    %c0 = arith.constant 0 : index
    %c0_0 = arith.constant 0 : index
    %0 = vector.load %arg1[%c0, %c0_0] : memref<256x256xbf16, #tpu.memory_space<vmem>>, vector<256x256xbf16>
    %c0_1 = arith.constant 0 : index
    %c0_2 = arith.constant 0 : index
    %1 = vector.load %arg2[%c0_1, %c0_2] : memref<256x128xbf16, #tpu.memory_space<vmem>>, vector<256x128xbf16>
    %cst = arith.constant dense<0.000000e+00> : vector<256x128xf32>
    %2 = tpu.matmul %0, %1, %cst {dimension_numbers = #tpu.dot_dimension_numbers<[1], [0], [0], [1], [0, 0, 1, 1], [], []>} : vector<256x256xbf16>, vector<256x128xbf16>, vector<256x128xf32> -> vector<256x128xf32>
    %c0_3 = arith.constant 0 : index
    %c0_4 = arith.constant 0 : index
    %3 = vector.load %arg3[%c0_3, %c0_4] : memref<8x128xf32, #tpu.memory_space<vmem>>, vector<1x128xf32>
    %4 = vector.broadcast %3 : vector<1x128xf32> to vector<256x128xf32>
    %5 = arith.addf %2, %4 : vector<256x128xf32>
    %cst_5 = arith.constant 0.000000e+00 : f32
    %6 = vector.broadcast %cst_5 : f32 to vector<256x128xf32>
    %7 = arith.maximumf %5, %6 : vector<256x128xf32>
    %c0_6 = arith.constant 0 : index
    %c0_7 = arith.constant 0 : index
    %8 = vector.load %arg4[%c0_6, %c0_7] : memref<256x128xf32, #tpu.memory_space<vmem>>, vector<256x128xf32>
    tpu.vector_store %arg4[%c0_6, %c0_7], %7 {strides = array<i32>} : memref<256x128xf32, #tpu.memory_space<vmem>>, vector<256x128xf32>,
    return
  }
  func.func @transform_0(%arg0: i32) -> (i32, i32) {
    %c0_i32 = arith.constant 0 : i32
    %c0_i32_0 = arith.constant 0 : i32
    return %arg0, %c0_i32 : i32, i32
  }
  func.func @transform_1(%arg0: i32) -> (i32, i32) {
    %c0_i32 = arith.constant 0 : i32
    %c0_i32_0 = arith.constant 0 : i32
    %c0_i32_1 = arith.constant 0 : i32
    return %c0_i32, %c0_i32_0 : i32, i32
  }
  func.func @transform_2(%arg0: i32) -> (i32, i32) {
    %c0_i32 = arith.constant 0 : i32
    %c0_i32_0 = arith.constant 0 : i32
    %c0_i32_1 = arith.constant 0 : i32
    return %c0_i32, %c0_i32_0 : i32, i32
  }
  func.func @transform_3(%arg0: i32) -> (i32, i32) {
    %c0_i32 = arith.constant 0 : i32
    %c0_i32_0 = arith.constant 0 : i32
    return %arg0, %c0_i32 : i32, i32
  }
}

</mosaic_0001>

<bundles_post_ra>
// kernel: mousenet_3d_forward.7
= control target key start
LH: loop header
LB: loop body
LE: loop exit
PB: predicated region body
PF: predicated region fallthrough
CT: control target
= control target key end

     0   :  { %s1237_s12 = smov 0   ;;  %s1451_s0 = inlined_call_operand.vmem [shape: bf16[2048,128], index: 0, kind: input, shape index: {}]   ;;  %s1452_s1 = inlined_call_operand.vmem [shape: bf16[128,128], index: 1, kind: input, shape index: {}]   ;;  %s1453_s2 = inlined_call_operand.vmem [shape: f32[8,128], index: 2, kind: input, shape index: {}]   ;;  %s1454_s3 = inlined_call_operand.vmem [shape: f32[2048,128], index: 3, kind: output, shape index: {}]  }
   0x1 LB: > { %s973_s13 = sadd.s32 4294967295, %s1215_s12   ;;  %p977_p0 = scmp.ge.s32.totalorder %s1215_s12, 1  ;;  %s1215_s12 = sphi %s1237_s12, %s13_s12  }
   0x2   : > { %p138_p1 = scmp.lt.s32.totalorder %s1215_s12, 5 }
   0x4   : > { %p139_p2 = pnand %p977_p0, %p138_p1 }
   0x5   : > { %v1169_v0 = vld [vmem:[%s1452_s1] sm:$0xff] (!%p139_p2)   ;;  %s978_s16 = sshll.u32 (!%p139_p2), %s973_s13, 6  ;;  %v1170_v1 = vld [vmem:[%s1452_s1 + $0x8] sm:$0xff] (!%p139_p2)   ;;  %v1171_v2 = vld [vmem:[%s1452_s1 + $0x10] sm:$0xff] (!%p139_p2)  }
   0x6   : > { %142 = sbr.rel (%p139_p2) target bundleno = 314 (0x13a), region = 32  ;;  %p163_p3 = scmp.lt.s32.totalorder (!%p139_p2), %s978_s16, 255  ;;  %1065 = vmatprep.subr.bf16.mxu0 (!%p139_p2), %v1169_v0  ;;  %1145 = vmatprep.subr.bf16.mxu1 (!%p139_p2), %v1169_v0  ;;  %v1172_v3 = vld [vmem:[%s1452_s1 + $0x18] sm:$0xff] (!%p139_p2)   ;;  %v1173_v6 = vld [vmem:[%s1452_s1 + $0x20] sm:$0xff] (!%p139_p2)   ;;  %v1174_v7 = vld [vmem:[%s1452_s1 + $0x28] sm:$0xff] (!%p139_p2)  }
   0x7   : > { %1066 = vmatpush3.bf16.msra.mxu0 (!%p139_p2), %v1169_v0  ;;  %1153 = vmatpush3.bf16.msra.mxu1 (!%p139_p2), %v1169_v0  ;;  %v1175_v8 = vld [vmem:[%s1452_s1 + $0x30] sm:$0xff] (!%p139_p2)   ;;  %v1176_v9 = vld [vmem:[%s1452_s1 + $0x38] sm:$0xff] (!%p139_p2)   ;;  %v1312_v40 = vld [vmem:[%s1453_s2] ss:$0 sm:$0xff] (!%p139_p2) }
   0x8   : > { %1067 = vmatprep.subr.bf16.mxu0 (!%p139_p2), %v1170_v1  ;;  %1146 = vmatprep.subr.bf16.mxu1 (!%p139_p2), %v1170_v1 }
   0xb   : > { %1068 = vmatpush3.bf16.msra.mxu0 (!%p139_p2), %v1170_v1  ;;  %1154 = vmatpush3.bf16.msra.mxu1 (!%p139_p2), %v1170_v1 }
   0xc   : > { %1069 = vmatprep.subr.bf16.mxu0 (!%p139_p2), %v1171_v2  ;;  %1147 = vmatprep.subr.bf16.mxu1 (!%p139_p2), %v1171_v2 }
   0xd   : > { %s1456_s16 = smov (!%p163_p3, %s978_s16), 255 }
   0xe   : > { %s979_s21 = sshll.u32 %s1456_s16, 2  ;;  %s981_s10 = sshll.u32 %s1456_s16, 3 }
   0xf   : > { %s1260_s24 = scalar_lea.vmem %s1451_s0, %s979_s21  ;;  %1070 = vmatpush3.bf16.msra.mxu0 %v1171_v2  ;;  %1155 = vmatpush3.bf16.msra.mxu1 %v1171_v2  ;;  %s1320_s14 = scalar_lea.vmem %s1454_s3, %s981_s10 }
  0x10   : > { %v1177_v4 = vld [vmem:[%s1260_s24] sm:$0xff]   ;;  %1071 = vmatprep.subr.bf16.mxu0 %v1172_v3  ;;  %1148 = vmatprep.subr.bf16.mxu1 %v1172_v3  ;;  %v1179_v10 = vld [vmem:[%s1260_s24 + $0x8] sm:$0xff]   ;;  %v1181_v12 = vld [vmem:[%s1260_s24 + $0x10] sm:$0xff]  }
  0x11   : > { %v1178_v5 = vld [vmem:[%s1260_s24 + $0x80] sm:$0xff]   ;;  %1081 = vmatprep.mubr.bf16.mxu0 %v1177_v4  ;;  %v1180_v11 = vld [vmem:[%s1260_s24 + $0x88] sm:$0xff]   ;;  %v1182_v13 = vld [vmem:[%s1260_s24 + $0x90] sm:$0xff]  }
  0x12   : > { %1113 = vmatprep.mubr.bf16.mxu1 %v1178_v5  ;;  %v1183_v14 = vld [vmem:[%s1260_s24 + $0x18] sm:$0xff]   ;;  %v1185_v16 = vld [vmem:[%s1260_s24 + $0x20] sm:$0xff]   ;;  %v1187_v18 = vld [vmem:[%s1260_s24 + $0x28] sm:$0xff]  }
  0x13   : > { %1072 = vmatpush3.bf16.msra.mxu0 %v1172_v3  ;;  %1156 = vmatpush3.bf16.msra.mxu1 %v1172_v3  ;;  %v1184_v15 = vld [vmem:[%s1260_s24 + $0x98] sm:$0xff]   ;;  %v1186_v17 = vld [vmem:[%s1260_s24 + $0xa0] sm:$0xff]   ;;  %v1188_v19 = vld [vmem:[%s1260_s24 + $0xa8] sm:$0xff]  }
  0x14   : > { %1073 = vmatprep.subr.bf16.mxu0 %v1173_v6  ;;  %1149 = vmatprep.subr.bf16.mxu1 %v1173_v6  ;;  %v1189_v20 = vld [vmem:[%s1260_s24 + $0x30] sm:$0xff]   ;;  %v1191_v22 = vld [vmem:[%s1260_s24 + $0x38] sm:$0xff]   ;;  %v1193_v24 = vld [vmem:[%s1260_s24 + $0x40] sm:$0xff]  }
  0x15   : > { %v1190_v21 = vld [vmem:[%s1260_s24 + $0xb0] sm:$0xff]   ;;  %v1192_v23 = vld [vmem:[%s1260_s24 + $0xb8] sm:$0xff]   ;;  %v1194_v25 = vld [vmem:[%s1260_s24 + $0xc0] sm:$0xff]  }
  0x16   : > { %v1195_v26 = vld [vmem:[%s1260_s24 + $0x48] sm:$0xff]   ;;  %v1197_v28 = vld [vmem:[%s1260_s24 + $0x50] sm:$0xff]   ;;  %v1199_v30 = vld [vmem:[%s1260_s24 + $0x58] sm:$0xff]  }
  0x17   : > { %1074 = vmatpush3.bf16.msra.mxu0 %v1173_v6  ;;  %1157 = vmatpush3.bf16.msra.mxu1 %v1173_v6  ;;  %v1196_v27 = vld [vmem:[%s1260_s24 + $0xc8] sm:$0xff]   ;;  %v1198_v29 = vld [vmem:[%s1260_s24 + $0xd0] sm:$0xff]   ;;  %v1200_v31 = vld [vmem:[%s1260_s24 + $0xd8] sm:$0xff]  }
  0x18   : > { %1075 = vmatprep.subr.bf16.mxu0 %v1174_v7  ;;  %1150 = vmatprep.subr.bf16.mxu1 %v1174_v7  ;;  %v1201_v32 = vld [vmem:[%s1260_s24 + $0x60] sm:$0xff]   ;;  %v1203_v34 = vld [vmem:[%s1260_s24 + $0x68] sm:$0xff]   ;;  %v1205_v36 = vld [vmem:[%s1260_s24 + $0x70] sm:$0xff]  }
  0x19   : > { %v1202_v33 = vld [vmem:[%s1260_s24 + $0xe0] sm:$0xff]   ;;  %v1204_v35 = vld [vmem:[%s1260_s24 + $0xe8] sm:$0xff]   ;;  %v1206_v37 = vld [vmem:[%s1260_s24 + $0xf0] sm:$0xff]  }
  0x1a   : > { %v1207_v38 = vld [vmem:[%s1260_s24 + $0x78] sm:$0xff]  }
  0x1b   : > { %1076 = vmatpush3.bf16.msra.mxu0 %v1174_v7  ;;  %1158 = vmatpush3.bf16.msra.mxu1 %v1174_v7  ;;  %v1208_v39 = vld [vmem:[%s1260_s24 + $0xf8] sm:$0xff]  }
  0x1c   : > { %1077 = vmatprep.subr.bf16.mxu0 %v1175_v8  ;;  %1151 = vmatprep.subr.bf16.mxu1 %v1175_v8 }
  0x1f   : > { %1078 = vmatpush3.bf16.msra.mxu0 %v1175_v8  ;;  %1159 = vmatpush3.bf16.msra.mxu1 %v1175_v8 }
  0x20   : > { %1079 = vmatprep.subr.bf16.mxu0 %v1176_v9  ;;  %1152 = vmatprep.subr.bf16.mxu1 %v1176_v9 }
  0x23   : > { %1080 = vmatpush3.bf16.msra.mxu0 %v1176_v9  ;;  %1160 = vmatpush3.bf16.msra.mxu1 %v1176_v9 }
  0x26   : > { %1082 = vmatmul.mubr.bf16.vlgmr.msra.gmra.mrb[0].mxu0 %v1179_v10  ;;  %1114 = vmatmul.mubr.bf16.vlgmr.msra.gmra.mrb[0].mxu1 %v1180_v11 }
  0x27   : > { %1085 = vmatprep.mubr.bf16.mxu0 %v1181_v12  ;;  %1117 = vmatprep.mubr.bf16.mxu1 %v1182_v13 }
  0x2e   : > { %1086 = vmatmul.mubr.bf16.gmra.mrb[4].mxu0 %v1183_v14  ;;  %1118 = vmatmul.mubr.bf16.gmra.mrb[4].mxu1 %v1184_v15 }
  0x2f   : > { %1089 = vmatprep.mubr.bf16.mxu0 %v1185_v16  ;;  %1121 = vmatprep.mubr.bf16.mxu1 %v1186_v17 }
  0x36   : > { %1090 = vmatmul.mubr.bf16.gmra.mrb[8].mxu0 %v1187_v18  ;;  %1122 = vmatmul.mubr.bf16.gmra.mrb[8].mxu1 %v1188_v19 }
  0x37   : > { %1093 = vmatprep.mubr.bf16.mxu0 %v1189_v20  ;;  %1125 = vmatprep.mubr.bf16.mxu1 %v1190_v21 }
  0x3e   : > { %1094 = vmatmul.mubr.bf16.gmra.mrb[12].mxu0 %v1191_v22  ;;  %1126 = vmatmul.mubr.bf16.gmra.mrb[12].mxu1 %v1192_v23 }
  0x3f   : > { %1097 = vmatprep.mubr.bf16.mxu0 %v1193_v24  ;;  %1129 = vmatprep.mubr.bf16.mxu1 %v1194_v25 }
  0x46   : > { %1098 = vmatmul.mubr.bf16.gmra.mrb[16].mxu0 %v1195_v26  ;;  %1130 = vmatmul.mubr.bf16.gmra.mrb[16].mxu1 %v1196_v27 }
  0x47   : > { %1101 = vmatprep.mubr.bf16.mxu0 %v1197_v28  ;;  %1133 = vmatprep.mubr.bf16.mxu1 %v1198_v29 }
  0x4e   : > { %1102 = vmatmul.mubr.bf16.gmra.mrb[20].mxu0 %v1199_v30  ;;  %1134 = vmatmul.mubr.bf16.gmra.mrb[20].mxu1 %v1200_v31 }
  0x4f   : > { %1105 = vmatprep.mubr.bf16.mxu0 %v1201_v32  ;;  %1137 = vmatprep.mubr.bf16.mxu1 %v1202_v33 }
  0x56   : > { %1106 = vmatmul.mubr.bf16.gmra.mrb[24].mxu0 %v1203_v34  ;;  %1138 = vmatmul.mubr.bf16.gmra.mrb[24].mxu1 %v1204_v35 }
  0x57   : > { %1109 = vmatprep.mubr.bf16.mxu0 %v1205_v36  ;;  %1141 = vmatprep.mubr.bf16.mxu1 %v1206_v37 }
  0x5e   : > { %1110 = vmatmul.mubr.bf16.gmra.mrb[28].mxu0 %v1207_v38  ;;  %1142 = vmatmul.mubr.bf16.gmra.mrb[28].mxu1 %v1208_v39 }
  0xf9   : > { %v1083_v41 = vpop.f32.mrb[0].mxu0  ;;  %v1115_v42 = vpop.f32.mrb[0].mxu1 }
  0xfa   : > { %v543_v43 = vadd.f32 %v1083_v41, %v1312_v40  ;;  %v671_v44 = vadd.f32 %v1115_v42, %v1312_v40  ;;  %v534_v45 = vpop.f32.mrb[1].mxu0  ;;  %v662_v46 = vpop.f32.mrb[1].mxu1 }
  0xfb   : > { %v535_v47 = vadd.f32 %v1312_v40, %v534_v45  ;;  %v663_v48 = vadd.f32 %v1312_v40, %v662_v46  ;;  %v1084_v49 = vpop.f32.mrb[2].mxu0  ;;  %v1116_v50 = vpop.f32.mrb[2].mxu1 }
  0xfc   : > { %v791_v51 = vmax.f32 %v543_v43, 0.0  ;;  %v823_v52 = vmax.f32 %v671_v44, 0.0  ;;  %v546_v53 = vadd.f32 %v1084_v49, %v1312_v40  ;;  %v674_v54 = vadd.f32 %v1116_v50, %v1312_v40  ;;  %v537_v55 = vpop.f32.mrb[3].mxu0  ;;  %v665_v56 = vpop.f32.mrb[3].mxu1 }
  0xfd   : > { %v789_v57 = vmax.f32 %v535_v47, 0.0  ;;  %v821_v58 = vmax.f32 %v663_v48, 0.0  ;;  %v538_v59 = vadd.f32 %v1312_v40, %v537_v55  ;;  %v666_v60 = vadd.f32 %v1312_v40, %v665_v56 }
  0xfe   : > { %855 = vst [vmem:[%s1320_s14 + $0x10] sm:$0xff] %v791_v51  ;;  %887 = vst [vmem:[%s1320_s14 + $0x110] sm:$0xff] %v823_v52  ;;  %v792_v61 = vmax.f32 %v546_v53, 0.0  ;;  %v824_v62 = vmax.f32 %v674_v54, 0.0 }
  0xff   : > { %853 = vst [vmem:[%s1320_s14] sm:$0xff] %v789_v57  ;;  %885 = vst [vmem:[%s1320_s14 + $0x100] sm:$0xff] %v821_v58  ;;  %v790_v63 = vmax.f32 %v538_v59, 0.0  ;;  %v822_v0 = vmax.f32 %v666_v60, 0.0 }
 0x100   : > { %856 = vst [vmem:[%s1320_s14 + $0x18] sm:$0xff] %v792_v61  ;;  %888 = vst [vmem:[%s1320_s14 + $0x118] sm:$0xff] %v824_v62 }
 0x101   : > { %854 = vst [vmem:[%s1320_s14 + $0x8] sm:$0xff] %v790_v63  ;;  %886 = vst [vmem:[%s1320_s14 + $0x108] sm:$0xff] %v822_v0  ;;  %v1087_v1 = vpop.f32.mrb[4].mxu0  ;;  %v1119_v2 = vpop.f32.mrb[4].mxu1 }
 0x102   : > { %v559_v3 = vadd.f32 %v1087_v1, %v1312_v40  ;;  %v687_v4 = vadd.f32 %v1119_v2, %v1312_v40  ;;  %v550_v5 = vpop.f32.mrb[5].mxu0  ;;  %v678_v6 = vpop.f32.mrb[5].mxu1 }
 0x103   : > { %v551_v7 = vadd.f32 %v1312_v40, %v550_v5  ;;  %v679_v8 = vadd.f32 %v1312_v40, %v678_v6  ;;  %v1088_v9 = vpop.f32.mrb[6].mxu0  ;;  %v1120_v10 = vpop.f32.mrb[6].mxu1 }
 0x104   : > { %v795_v11 = vmax.f32 %v559_v3, 0.0  ;;  %v827_v12 = vmax.f32 %v687_v4, 0.0  ;;  %v562_v13 = vadd.f32 %v1088_v9, %v1312_v40  ;;  %v690_v14 = vadd.f32 %v1120_v10, %v1312_v40  ;;  %v553_v15 = vpop.f32.mrb[7].mxu0  ;;  %v681_v16 = vpop.f32.mrb[7].mxu1 }
 0x105   : > { %v793_v17 = vmax.f32 %v551_v7, 0.0  ;;  %v825_v18 = vmax.f32 %v679_v8, 0.0  ;;  %v554_v19 = vadd.f32 %v1312_v40, %v553_v15  ;;  %v682_v20 = vadd.f32 %v1312_v40, %v681_v16 }
 0x106   : > { %859 = vst [vmem:[%s1320_s14 + $0x30] sm:$0xff] %v795_v11  ;;  %891 = vst [vmem:[%s1320_s14 + $0x130] sm:$0xff] %v827_v12  ;;  %v796_v21 = vmax.f32 %v562_v13, 0.0  ;;  %v828_v22 = vmax.f32 %v690_v14, 0.0 }
 0x107   : > { %857 = vst [vmem:[%s1320_s14 + $0x20] sm:$0xff] %v793_v17  ;;  %889 = vst [vmem:[%s1320_s14 + $0x120] sm:$0xff] %v825_v18  ;;  %v794_v23 = vmax.f32 %v554_v19, 0.0  ;;  %v826_v24 = vmax.f32 %v682_v20, 0.0 }
 0x108   : > { %860 = vst [vmem:[%s1320_s14 + $0x38] sm:$0xff] %v796_v21  ;;  %892 = vst [vmem:[%s1320_s14 + $0x138] sm:$0xff] %v828_v22 }
 0x109   : > { %858 = vst [vmem:[%s1320_s14 + $0x28] sm:$0xff] %v794_v23  ;;  %890 = vst [vmem:[%s1320_s14 + $0x128] sm:$0xff] %v826_v24  ;;  %v1091_v25 = vpop.f32.mrb[8].mxu0  ;;  %v1123_v26 = vpop.f32.mrb[8].mxu1 }
 0x10a   : > { %v575_v27 = vadd.f32 %v1091_v25, %v1312_v40  ;;  %v703_v28 = vadd.f32 %v1123_v26, %v1312_v40  ;;  %v566_v29 = vpop.f32.mrb[9].mxu0  ;;  %v694_v30 = vpop.f32.mrb[9].mxu1 }
 0x10b   : > { %v567_v31 = vadd.f32 %v1312_v40, %v566_v29  ;;  %v695_v32 = vadd.f32 %v1312_v40, %v694_v30  ;;  %v1092_v33 = vpop.f32.mrb[10].mxu0  ;;  %v1124_v34 = vpop.f32.mrb[10].mxu1 }
 0x10c   : > { %v799_v35 = vmax.f32 %v575_v27, 0.0  ;;  %v831_v36 = vmax.f32 %v703_v28, 0.0  ;;  %v578_v37 = vadd.f32 %v1092_v33, %v1312_v40  ;;  %v706_v38 = vadd.f32 %v1124_v34, %v1312_v40  ;;  %v569_v39 = vpop.f32.mrb[11].mxu0  ;;  %v697_v41 = vpop.f32.mrb[11].mxu1 }
 0x10d   : > { %v797_v42 = vmax.f32 %v567_v31, 0.0  ;;  %v829_v43 = vmax.f32 %v695_v32, 0.0  ;;  %v570_v44 = vadd.f32 %v1312_v40, %v569_v39  ;;  %v698_v45 = vadd.f32 %v1312_v40, %v697_v41 }
 0x10e   : > { %863 = vst [vmem:[%s1320_s14 + $0x50] sm:$0xff] %v799_v35  ;;  %895 = vst [vmem:[%s1320_s14 + $0x150] sm:$0xff] %v831_v36  ;;  %v800_v46 = vmax.f32 %v578_v37, 0.0  ;;  %v832_v47 = vmax.f32 %v706_v38, 0.0 }
 0x10f   : > { %861 = vst [vmem:[%s1320_s14 + $0x40] sm:$0xff] %v797_v42  ;;  %893 = vst [vmem:[%s1320_s14 + $0x140] sm:$0xff] %v829_v43  ;;  %v798_v48 = vmax.f32 %v570_v44, 0.0  ;;  %v830_v49 = vmax.f32 %v698_v45, 0.0 }
 0x110   : > { %864 = vst [vmem:[%s1320_s14 + $0x58] sm:$0xff] %v800_v46  ;;  %896 = vst [vmem:[%s1320_s14 + $0x158] sm:$0xff] %v832_v47 }
 0x111   : > { %862 = vst [vmem:[%s1320_s14 + $0x48] sm:$0xff] %v798_v48  ;;  %894 = vst [vmem:[%s1320_s14 + $0x148] sm:$0xff] %v830_v49  ;;  %v1095_v50 = vpop.f32.mrb[12].mxu0  ;;  %v1127_v51 = vpop.f32.mrb[12].mxu1 }
 0x112   : > { %v591_v52 = vadd.f32 %v1095_v50, %v1312_v40  ;;  %v719_v53 = vadd.f32 %v1127_v51, %v1312_v40  ;;  %v582_v54 = vpop.f32.mrb[13].mxu0  ;;  %v710_v55 = vpop.f32.mrb[13].mxu1 }
 0x113   : > { %v583_v56 = vadd.f32 %v1312_v40, %v582_v54  ;;  %v711_v57 = vadd.f32 %v1312_v40, %v710_v55  ;;  %v1096_v58 = vpop.f32.mrb[14].mxu0  ;;  %v1128_v59 = vpop.f32.mrb[14].mxu1 }
 0x114   : > { %v803_v60 = vmax.f32 %v591_v52, 0.0  ;;  %v835_v61 = vmax.f32 %v719_v53, 0.0  ;;  %v594_v62 = vadd.f32 %v1096_v58, %v1312_v40  ;;  %v722_v63 = vadd.f32 %v1128_v59, %v1312_v40  ;;  %v585_v0 = vpop.f32.mrb[15].mxu0  ;;  %v713_v1 = vpop.f32.mrb[15].mxu1 }
 0x115   : > { %v801_v2 = vmax.f32 %v583_v56, 0.0  ;;  %v833_v3 = vmax.f32 %v711_v57, 0.0  ;;  %v586_v4 = vadd.f32 %v1312_v40, %v585_v0  ;;  %v714_v5 = vadd.f32 %v1312_v40, %v713_v1 }
 0x116   : > { %867 = vst [vmem:[%s1320_s14 + $0x70] sm:$0xff] %v803_v60  ;;  %899 = vst [vmem:[%s1320_s14 + $0x170] sm:$0xff] %v835_v61  ;;  %v804_v6 = vmax.f32 %v594_v62, 0.0  ;;  %v836_v7 = vmax.f32 %v722_v63, 0.0 }
 0x117   : > { %865 = vst [vmem:[%s1320_s14 + $0x60] sm:$0xff] %v801_v2  ;;  %897 = vst [vmem:[%s1320_s14 + $0x160] sm:$0xff] %v833_v3  ;;  %v802_v8 = vmax.f32 %v586_v4, 0.0  ;;  %v834_v9 = vmax.f32 %v714_v5, 0.0 }
 0x118   : > { %868 = vst [vmem:[%s1320_s14 + $0x78] sm:$0xff] %v804_v6  ;;  %900 = vst [vmem:[%s1320_s14 + $0x178] sm:$0xff] %v836_v7 }
 0x119   : > { %866 = vst [vmem:[%s1320_s14 + $0x68] sm:$0xff] %v802_v8  ;;  %898 = vst [vmem:[%s1320_s14 + $0x168] sm:$0xff] %v834_v9  ;;  %v1099_v10 = vpop.f32.mrb[16].mxu0  ;;  %v1131_v11 = vpop.f32.mrb[16].mxu1 }
 0x11a   : > { %v607_v12 = vadd.f32 %v1099_v10, %v1312_v40  ;;  %v735_v13 = vadd.f32 %v1131_v11, %v1312_v40  ;;  %v598_v14 = vpop.f32.mrb[17].mxu0  ;;  %v726_v15 = vpop.f32.mrb[17].mxu1 }
 0x11b   : > { %v599_v16 = vadd.f32 %v1312_v40, %v598_v14  ;;  %v727_v17 = vadd.f32 %v1312_v40, %v726_v15  ;;  %v1100_v18 = vpop.f32.mrb[18].mxu0  ;;  %v1132_v19 = vpop.f32.mrb[18].mxu1 }
 0x11c   : > { %v807_v20 = vmax.f32 %v607_v12, 0.0  ;;  %v839_v21 = vmax.f32 %v735_v13, 0.0  ;;  %v610_v22 = vadd.f32 %v1100_v18, %v1312_v40  ;;  %v738_v23 = vadd.f32 %v1132_v19, %v1312_v40  ;;  %v601_v24 = vpop.f32.mrb[19].mxu0  ;;  %v729_v25 = vpop.f32.mrb[19].mxu1 }
 0x11d   : > { %v805_v26 = vmax.f32 %v599_v16, 0.0  ;;  %v837_v27 = vmax.f32 %v727_v17, 0.0  ;;  %v602_v28 = vadd.f32 %v1312_v40, %v601_v24  ;;  %v730_v29 = vadd.f32 %v1312_v40, %v729_v25 }
 0x11e   : > { %871 = vst [vmem:[%s1320_s14 + $0x90] sm:$0xff] %v807_v20  ;;  %903 = vst [vmem:[%s1320_s14 + $0x190] sm:$0xff] %v839_v21  ;;  %v808_v30 = vmax.f32 %v610_v22, 0.0  ;;  %v840_v31 = vmax.f32 %v738_v23, 0.0 }
 0x11f   : > { %869 = vst [vmem:[%s1320_s14 + $0x80] sm:$0xff] %v805_v26  ;;  %901 = vst [vmem:[%s1320_s14 + $0x180] sm:$0xff] %v837_v27  ;;  %v806_v32 = vmax.f32 %v602_v28, 0.0  ;;  %v838_v33 = vmax.f32 %v730_v29, 0.0 }
 0x120   : > { %872 = vst [vmem:[%s1320_s14 + $0x98] sm:$0xff] %v808_v30  ;;  %904 = vst [vmem:[%s1320_s14 + $0x198] sm:$0xff] %v840_v31 }
 0x121   : > { %870 = vst [vmem:[%s1320_s14 + $0x88] sm:$0xff] %v806_v32  ;;  %902 = vst [vmem:[%s1320_s14 + $0x188] sm:$0xff] %v838_v33  ;;  %v1103_v34 = vpop.f32.mrb[20].mxu0  ;;  %v1135_v35 = vpop.f32.mrb[20].mxu1 }
 0x122   : > { %v623_v36 = vadd.f32 %v1103_v34, %v1312_v40  ;;  %v751_v37 = vadd.f32 %v1135_v35, %v1312_v40  ;;  %v614_v38 = vpop.f32.mrb[21].mxu0  ;;  %v742_v39 = vpop.f32.mrb[21].mxu1 }
 0x123   : > { %v615_v41 = vadd.f32 %v1312_v40, %v614_v38  ;;  %v743_v42 = vadd.f32 %v1312_v40, %v742_v39  ;;  %v1104_v43 = vpop.f32.mrb[22].mxu0  ;;  %v1136_v44 = vpop.f32.mrb[22].mxu1 }
 0x124   : > { %v811_v45 = vmax.f32 %v623_v36, 0.0  ;;  %v843_v46 = vmax.f32 %v751_v37, 0.0  ;;  %v626_v47 = vadd.f32 %v1104_v43, %v1312_v40  ;;  %v754_v48 = vadd.f32 %v1136_v44, %v1312_v40  ;;  %v617_v49 = vpop.f32.mrb[23].mxu0  ;;  %v745_v50 = vpop.f32.mrb[23].mxu1 }
 0x125   : > { %v809_v51 = vmax.f32 %v615_v41, 0.0  ;;  %v841_v52 = vmax.f32 %v743_v42, 0.0  ;;  %v618_v53 = vadd.f32 %v1312_v40, %v617_v49  ;;  %v746_v54 = vadd.f32 %v1312_v40, %v745_v50 }
 0x126   : > { %875 = vst [vmem:[%s1320_s14 + $0xb0] sm:$0xff] %v811_v45  ;;  %907 = vst [vmem:[%s1320_s14 + $0x1b0] sm:$0xff] %v843_v46  ;;  %v812_v55 = vmax.f32 %v626_v47, 0.0  ;;  %v844_v56 = vmax.f32 %v754_v48, 0.0 }
 0x127   : > { %873 = vst [vmem:[%s1320_s14 + $0xa0] sm:$0xff] %v809_v51  ;;  %905 = vst [vmem:[%s1320_s14 + $0x1a0] sm:$0xff] %v841_v52  ;;  %v810_v57 = vmax.f32 %v618_v53, 0.0  ;;  %v842_v58 = vmax.f32 %v746_v54, 0.0 }
 0x128   : > { %876 = vst [vmem:[%s1320_s14 + $0xb8] sm:$0xff] %v812_v55  ;;  %908 = vst [vmem:[%s1320_s14 + $0x1b8] sm:$0xff] %v844_v56 }
 0x129   : > { %874 = vst [vmem:[%s1320_s14 + $0xa8] sm:$0xff] %v810_v57  ;;  %906 = vst [vmem:[%s1320_s14 + $0x1a8] sm:$0xff] %v842_v58  ;;  %v1107_v59 = vpop.f32.mrb[24].mxu0  ;;  %v1139_v60 = vpop.f32.mrb[24].mxu1 }
 0x12a   : > { %v639_v61 = vadd.f32 %v1107_v59, %v1312_v40  ;;  %v767_v62 = vadd.f32 %v1139_v60, %v1312_v40  ;;  %v630_v63 = vpop.f32.mrb[25].mxu0  ;;  %v758_v0 = vpop.f32.mrb[25].mxu1 }
 0x12b   : > { %v631_v1 = vadd.f32 %v1312_v40, %v630_v63  ;;  %v759_v2 = vadd.f32 %v1312_v40, %v758_v0  ;;  %v1108_v3 = vpop.f32.mrb[26].mxu0  ;;  %v1140_v4 = vpop.f32.mrb[26].mxu1 }
 0x12c   : > { %v815_v5 = vmax.f32 %v639_v61, 0.0  ;;  %v847_v6 = vmax.f32 %v767_v62, 0.0  ;;  %v642_v7 = vadd.f32 %v1108_v3, %v1312_v40  ;;  %v770_v8 = vadd.f32 %v1140_v4, %v1312_v40  ;;  %v633_v9 = vpop.f32.mrb[27].mxu0  ;;  %v761_v10 = vpop.f32.mrb[27].mxu1 }
 0x12d   : > { %v813_v11 = vmax.f32 %v631_v1, 0.0  ;;  %v845_v12 = vmax.f32 %v759_v2, 0.0  ;;  %v634_v13 = vadd.f32 %v1312_v40, %v633_v9  ;;  %v762_v14 = vadd.f32 %v1312_v40, %v761_v10 }
 0x12e   : > { %879 = vst [vmem:[%s1320_s14 + $0xd0] sm:$0xff] %v815_v5  ;;  %911 = vst [vmem:[%s1320_s14 + $0x1d0] sm:$0xff] %v847_v6  ;;  %v816_v15 = vmax.f32 %v642_v7, 0.0  ;;  %v848_v16 = vmax.f32 %v770_v8, 0.0 }
 0x12f   : > { %877 = vst [vmem:[%s1320_s14 + $0xc0] sm:$0xff] %v813_v11  ;;  %909 = vst [vmem:[%s1320_s14 + $0x1c0] sm:$0xff] %v845_v12  ;;  %v814_v17 = vmax.f32 %v634_v13, 0.0  ;;  %v846_v18 = vmax.f32 %v762_v14, 0.0 }
 0x130   : > { %880 = vst [vmem:[%s1320_s14 + $0xd8] sm:$0xff] %v816_v15  ;;  %912 = vst [vmem:[%s1320_s14 + $0x1d8] sm:$0xff] %v848_v16 }
 0x131   : > { %878 = vst [vmem:[%s1320_s14 + $0xc8] sm:$0xff] %v814_v17  ;;  %910 = vst [vmem:[%s1320_s14 + $0x1c8] sm:$0xff] %v846_v18  ;;  %v1111_v19 = vpop.f32.mrb[28].mxu0  ;;  %v1143_v20 = vpop.f32.mrb[28].mxu1 }
 0x132   : > { %v655_v21 = vadd.f32 %v1111_v19, %v1312_v40  ;;  %v783_v22 = vadd.f32 %v1143_v20, %v1312_v40  ;;  %v646_v23 = vpop.f32.mrb[29].mxu0  ;;  %v774_v24 = vpop.f32.mrb[29].mxu1 }
 0x133   : > { %v647_v25 = vadd.f32 %v1312_v40, %v646_v23  ;;  %v775_v26 = vadd.f32 %v1312_v40, %v774_v24  ;;  %v1112_v27 = vpop.f32.mrb[30].mxu0  ;;  %v1144_v28 = vpop.f32.mrb[30].mxu1 }
 0x134   : > { %v819_v29 = vmax.f32 %v655_v21, 0.0  ;;  %v851_v30 = vmax.f32 %v783_v22, 0.0  ;;  %v658_v31 = vadd.f32 %v1112_v27, %v1312_v40  ;;  %v786_v32 = vadd.f32 %v1144_v28, %v1312_v40  ;;  %v649_v33 = vpop.f32.mrb[31].mxu0  ;;  %v777_v34 = vpop.f32.mrb[31].mxu1 }
 0x135   : > { %v817_v35 = vmax.f32 %v647_v25, 0.0  ;;  %v849_v36 = vmax.f32 %v775_v26, 0.0  ;;  %v650_v37 = vadd.f32 %v1312_v40, %v649_v33  ;;  %v778_v38 = vadd.f32 %v1312_v40, %v777_v34 }
 0x136   : > { %883 = vst [vmem:[%s1320_s14 + $0xf0] sm:$0xff] %v819_v29  ;;  %915 = vst [vmem:[%s1320_s14 + $0x1f0] sm:$0xff] %v851_v30  ;;  %v820_v39 = vmax.f32 %v658_v31, 0.0  ;;  %v852_v41 = vmax.f32 %v786_v32, 0.0 }
 0x137   : > { %881 = vst [vmem:[%s1320_s14 + $0xe0] sm:$0xff] %v817_v35  ;;  %913 = vst [vmem:[%s1320_s14 + $0x1e0] sm:$0xff] %v849_v36  ;;  %v818_v42 = vmax.f32 %v650_v37, 0.0  ;;  %v850_v43 = vmax.f32 %v778_v38, 0.0 }
 0x138   : > { %884 = vst [vmem:[%s1320_s14 + $0xf8] sm:$0xff] %v820_v39  ;;  %916 = vst [vmem:[%s1320_s14 + $0x1f8] sm:$0xff] %v852_v41 }
 0x139   : > { %882 = vst [vmem:[%s1320_s14 + $0xe8] sm:$0xff] %v818_v42  ;;  %914 = vst [vmem:[%s1320_s14 + $0x1e8] sm:$0xff] %v850_v43 }
 0x13a PF: > { %s13_s12 = sadd.s32 1, %s1215_s12  }
 0x13b   : > { %p10_p4 = scmp.ge.s32.totalorder %s13_s12, 6  }
 0x13d   :  { %12 = sbr.rel (!%p10_p4) target bundleno = 1 (0x1), region = 62 }

// kernel: mousenet_3d_forward.8
= control target key start
LH: loop header
LB: loop body
LE: loop exit
PB: predicated region body
PF: predicated region fallthrough
CT: control target
= control target key end

     0   :  { %s1444_s12 = smov 0   ;;  %s1749_s0 = inlined_call_operand.vmem [shape: bf16[2048,256], index: 0, kind: input, shape index: {}]   ;;  %s1750_s1 = inlined_call_operand.vmem [shape: bf16[256,128], index: 1, kind: input, shape index: {}]   ;;  %s1751_s2 = inlined_call_operand.vmem [shape: f32[8,128], index: 2, kind: input, shape index: {}]   ;;  %s1752_s3 = inlined_call_operand.vmem [shape: f32[2048,128], index: 3, kind: output, shape index: {}]  }
   0x1 LB: > { %s1168_s13 = sadd.s32 4294967295, %s1421_s12   ;;  %p1172_p0 = scmp.ge.s32.totalorder %s1421_s12, 1  ;;  %s1421_s12 = sphi %s1444_s12, %s13_s12  }
   0x2   : > { %p139_p1 = scmp.lt.s32.totalorder %s1421_s12, 5 }
   0x4   : > { %p140_p2 = pnand %p1172_p0, %p139_p1 }
   0x5   : > { %v1303_v0 = vld [vmem:[%s1750_s1] sm:$0xff] (!%p140_p2)   ;;  %v1423_v1 = vmov (!%p140_p2), 0   ;;  %s1173_s16 = sshll.u32 (!%p140_p2), %s1168_s13, 6  ;;  %v1304_v2 = vld [vmem:[%s1750_s1 + $0x8] sm:$0xff] (!%p140_p2)   ;;  %v1305_v3 = vld [vmem:[%s1750_s1 + $0x10] sm:$0xff] (!%p140_p2)  }
   0x6   : > { %143 = sbr.rel (%p140_p2) target bundleno = 409 (0x199), region = 32  ;;  %695 = vmatprep.subr.bf16.mxu0 (!%p140_p2), %v1423_v1  ;;  %1262 = vmatprep.subr.bf16.mxu1 (!%p140_p2), %v1423_v1  ;;  %p165_p3 = scmp.lt.s32.totalorder (!%p140_p2), %s1173_s16, 255  ;;  %v1306_v4 = vld [vmem:[%s1750_s1 + $0x18] sm:$0xff] (!%p140_p2)   ;;  %v1307_v5 = vld [vmem:[%s1750_s1 + $0x20] sm:$0xff] (!%p140_p2)   ;;  %v1308_v7 = vld [vmem:[%s1750_s1 + $0x28] sm:$0xff] (!%p140_p2)  }
   0x7   : > { %696 = vmatpush1.bf16.msra.mxu0 (!%p140_p2), %v1303_v0  ;;  %1278 = vmatpush1.bf16.msra.mxu1 (!%p140_p2), %v1303_v0  ;;  %v1309_v9 = vld [vmem:[%s1750_s1 + $0x30] sm:$0xff] (!%p140_p2)   ;;  %v1310_v10 = vld [vmem:[%s1750_s1 + $0x38] sm:$0xff] (!%p140_p2)   ;;  %v1311_v11 = vld [vmem:[%s1750_s1 + $0x40] sm:$0xff] (!%p140_p2)  }
   0x8   : > { %697 = vmatprep.subr.bf16.mxu0 (!%p140_p2), %v1423_v1  ;;  %1263 = vmatprep.subr.bf16.mxu1 (!%p140_p2), %v1423_v1  ;;  %v1312_v12 = vld [vmem:[%s1750_s1 + $0x48] sm:$0xff] (!%p140_p2)   ;;  %v1313_v13 = vld [vmem:[%s1750_s1 + $0x50] sm:$0xff] (!%p140_p2)   ;;  %v1314_v14 = vld [vmem:[%s1750_s1 + $0x58] sm:$0xff] (!%p140_p2)  }
   0x9   : > { %v1315_v15 = vld [vmem:[%s1750_s1 + $0x60] sm:$0xff] (!%p140_p2)   ;;  %v1316_v16 = vld [vmem:[%s1750_s1 + $0x68] sm:$0xff] (!%p140_p2)   ;;  %v1317_v17 = vld [vmem:[%s1750_s1 + $0x70] sm:$0xff] (!%p140_p2)  }
   0xa   : > { %v1318_v18 = vld [vmem:[%s1750_s1 + $0x78] sm:$0xff] (!%p140_p2)  }
   0xb   : > { %698 = vmatpush1.bf16.msra.mxu0 (!%p140_p2), %v1304_v2  ;;  %1279 = vmatpush1.bf16.msra.mxu1 (!%p140_p2), %v1304_v2 }
   0xc   : > { %699 = vmatprep.subr.bf16.mxu0 (!%p140_p2), %v1423_v1  ;;  %1264 = vmatprep.subr.bf16.mxu1 (!%p140_p2), %v1423_v1 }
   0xd   : > { %s1754_s16 = smov (!%p165_p3, %s1173_s16), 255 }
   0xe   : > { %s1261_s23 = sshll.u32 %s1754_s16, 3 }
   0xf   : > { %700 = vmatpush1.bf16.msra.mxu0 %v1305_v3  ;;  %1280 = vmatpush1.bf16.msra.mxu1 %v1305_v3  ;;  %s1483_s28 = scalar_lea.vmem %s1749_s0, %s1261_s23 }
  0x10   : > { %701 = vmatprep.subr.bf16.mxu0 %v1423_v1  ;;  %1265 = vmatprep.subr.bf16.mxu1 %v1423_v1  ;;  %v1321_v6 = vld [vmem:[%s1483_s28 + $0x4] ss:$8 sps:$4 sm:$0xff]   ;;  %v1319_v19 = vld [vmem:[%s1483_s28] ss:$8 sps:$4 sm:$0xff]   ;;  %v1325_v21 = vld [vmem:[%s1483_s28 + $0x14] ss:$8 sps:$4 sm:$0xff]  }
  0x11   : > { %v1324_v8 = vld [vmem:[%s1483_s28 + $0x104] ss:$8 sps:$4 sm:$0xff]   ;;  %727 = vmatprep.mubr.bf16.mxu0 %v1321_v6  ;;  %v1322_v20 = vld [vmem:[%s1483_s28 + $0x100] ss:$8 sps:$4 sm:$0xff]   ;;  %v1327_v22 = vld [vmem:[%s1483_s28 + $0x114] ss:$8 sps:$4 sm:$0xff]  }
  0x12   : > { %855 = vmatprep.mubr.bf16.mxu1 %v1324_v8  ;;  %v1329_v23 = vld [vmem:[%s1483_s28 + $0x10] ss:$8 sps:$4 sm:$0xff]   ;;  %v1331_v25 = vld [vmem:[%s1483_s28 + $0x24] ss:$8 sps:$4 sm:$0xff]   ;;  %v1335_v27 = vld [vmem:[%s1483_s28 + $0x20] ss:$8 sps:$4 sm:$0xff]  }
  0x13   : > { %702 = vmatpush1.bf16.msra.mxu0 %v1306_v4  ;;  %1281 = vmatpush1.bf16.msra.mxu1 %v1306_v4  ;;  %v1330_v24 = vld [vmem:[%s1483_s28 + $0x110] ss:$8 sps:$4 sm:$0xff]   ;;  %v1333_v26 = vld [vmem:[%s1483_s28 + $0x124] ss:$8 sps:$4 sm:$0xff]   ;;  %v1336_v28 = vld [vmem:[%s1483_s28 + $0x120] ss:$8 sps:$4 sm:$0xff]  }
  0x14   : > { %703 = vmatprep.subr.bf16.mxu0 %v1423_v1  ;;  %1266 = vmatprep.subr.bf16.mxu1 %v1423_v1  ;;  %v1337_v29 = vld [vmem:[%s1483_s28 + $0x34] ss:$8 sps:$4 sm:$0xff]   ;;  %v1341_v31 = vld [vmem:[%s1483_s28 + $0x30] ss:$8 sps:$4 sm:$0xff]   ;;  %v1343_v33 = vld [vmem:[%s1483_s28 + $0x44] ss:$8 sps:$4 sm:$0xff]  }
  0x15   : > { %v1339_v30 = vld [vmem:[%s1483_s28 + $0x134] ss:$8 sps:$4 sm:$0xff]   ;;  %v1342_v32 = vld [vmem:[%s1483_s28 + $0x130] ss:$8 sps:$4 sm:$0xff]   ;;  %v1345_v34 = vld [vmem:[%s1483_s28 + $0x144] ss:$8 sps:$4 sm:$0xff]  }
  0x16   : > { %v1347_v35 = vld [vmem:[%s1483_s28 + $0x40] ss:$8 sps:$4 sm:$0xff]   ;;  %v1349_v37 = vld [vmem:[%s1483_s28 + $0x54] ss:$8 sps:$4 sm:$0xff]   ;;  %v1353_v39 = vld [vmem:[%s1483_s28 + $0x50] ss:$8 sps:$4 sm:$0xff]  }
  0x17   : > { %704 = vmatpush1.bf16.msra.mxu0 %v1307_v5  ;;  %1282 = vmatpush1.bf16.msra.mxu1 %v1307_v5  ;;  %v1348_v36 = vld [vmem:[%s1483_s28 + $0x140] ss:$8 sps:$4 sm:$0xff]   ;;  %v1351_v38 = vld [vmem:[%s1483_s28 + $0x154] ss:$8 sps:$4 sm:$0xff]   ;;  %v1354_v40 = vld [vmem:[%s1483_s28 + $0x150] ss:$8 sps:$4 sm:$0xff]  }
  0x18   : > { %705 = vmatprep.subr.bf16.mxu0 %v1423_v1  ;;  %1267 = vmatprep.subr.bf16.mxu1 %v1423_v1  ;;  %v1355_v41 = vld [vmem:[%s1483_s28 + $0x64] ss:$8 sps:$4 sm:$0xff]   ;;  %v1359_v43 = vld [vmem:[%s1483_s28 + $0x60] ss:$8 sps:$4 sm:$0xff]   ;;  %v1361_v45 = vld [vmem:[%s1483_s28 + $0x74] ss:$8 sps:$4 sm:$0xff]  }
  0x19   : > { %v1357_v42 = vld [vmem:[%s1483_s28 + $0x164] ss:$8 sps:$4 sm:$0xff]   ;;  %v1360_v44 = vld [vmem:[%s1483_s28 + $0x160] ss:$8 sps:$4 sm:$0xff]   ;;  %v1363_v46 = vld [vmem:[%s1483_s28 + $0x174] ss:$8 sps:$4 sm:$0xff]  }
  0x1a   : > { %v1365_v47 = vld [vmem:[%s1483_s28 + $0x70] ss:$8 sps:$4 sm:$0xff]   ;;  %v1367_v49 = vld [vmem:[%s1483_s28 + $0x84] ss:$8 sps:$4 sm:$0xff]   ;;  %v1371_v51 = vld [vmem:[%s1483_s28 + $0x80] ss:$8 sps:$4 sm:$0xff]  }
  0x1b   : > { %706 = vmatpush1.bf16.msra.mxu0 %v1308_v7  ;;  %1283 = vmatpush1.bf16.msra.mxu1 %v1308_v7  ;;  %v1366_v48 = vld [vmem:[%s1483_s28 + $0x170] ss:$8 sps:$4 sm:$0xff]   ;;  %v1369_v50 = vld [vmem:[%s1483_s28 + $0x184] ss:$8 sps:$4 sm:$0xff]   ;;  %v1372_v52 = vld [vmem:[%s1483_s28 + $0x180] ss:$8 sps:$4 sm:$0xff]  }
  0x1c   : > { %707 = vmatprep.subr.bf16.mxu0 %v1423_v1  ;;  %1268 = vmatprep.subr.bf16.mxu1 %v1423_v1  ;;  %v1373_v53 = vld [vmem:[%s1483_s28 + $0x94] ss:$8 sps:$4 sm:$0xff]   ;;  %v1377_v55 = vld [vmem:[%s1483_s28 + $0x90] ss:$8 sps:$4 sm:$0xff]   ;;  %v1379_v57 = vld [vmem:[%s1483_s28 + $0xa4] ss:$8 sps:$4 sm:$0xff]  }
  0x1d   : > { %v1375_v54 = vld [vmem:[%s1483_s28 + $0x194] ss:$8 sps:$4 sm:$0xff]   ;;  %v1378_v56 = vld [vmem:[%s1483_s28 + $0x190] ss:$8 sps:$4 sm:$0xff]   ;;  %v1381_v58 = vld [vmem:[%s1483_s28 + $0x1a4] ss:$8 sps:$4 sm:$0xff]  }
  0x1e   : > { %v1383_v59 = vld [vmem:[%s1483_s28 + $0xa0] ss:$8 sps:$4 sm:$0xff]   ;;  %v1385_v61 = vld [vmem:[%s1483_s28 + $0xb4] ss:$8 sps:$4 sm:$0xff]   ;;  %v1389_v63 = vld [vmem:[%s1483_s28 + $0xb0] ss:$8 sps:$4 sm:$0xff]  }
  0x1f   : > { %708 = vmatpush1.bf16.msra.mxu0 %v1309_v9  ;;  %1284 = vmatpush1.bf16.msra.mxu1 %v1309_v9  ;;  %v1384_v60 = vld [vmem:[%s1483_s28 + $0x1a0] ss:$8 sps:$4 sm:$0xff]   ;;  %v1387_v62 = vld [vmem:[%s1483_s28 + $0x1b4] ss:$8 sps:$4 sm:$0xff]   ;;  %v1390_v0 = vld [vmem:[%s1483_s28 + $0x1b0] ss:$8 sps:$4 sm:$0xff]  }
  0x20   : > { %709 = vmatprep.subr.bf16.mxu0 %v1423_v1  ;;  %1269 = vmatprep.subr.bf16.mxu1 %v1423_v1  ;;  %v1393_v2 = vld [vmem:[%s1483_s28 + $0x1c4] ss:$8 sps:$4 sm:$0xff]   ;;  %v1395_v3 = vld [vmem:[%s1483_s28 + $0xc0] ss:$8 sps:$4 sm:$0xff]   ;;  %v1397_v5 = vld [vmem:[%s1483_s28 + $0xd4] ss:$8 sps:$4 sm:$0xff]  }
  0x21   : > { %v1396_v4 = vld [vmem:[%s1483_s28 + $0x1c0] ss:$8 sps:$4 sm:$0xff]   ;;  %v1399_v6 = vld [vmem:[%s1483_s28 + $0x1d4] ss:$8 sps:$4 sm:$0xff]   ;;  %v1401_v7 = vld [vmem:[%s1483_s28 + $0xd0] ss:$8 sps:$4 sm:$0xff]  }
  0x22   : > { %v1402_v8 = vld [vmem:[%s1483_s28 + $0x1d0] ss:$8 sps:$4 sm:$0xff]   ;;  %v1403_v9 = vld [vmem:[%s1483_s28 + $0xe4] ss:$8 sps:$4 sm:$0xff]  }
  0x23   : > { %710 = vmatpush1.bf16.msra.mxu0 %v1310_v10  ;;  %1285 = vmatpush1.bf16.msra.mxu1 %v1310_v10  ;;  %v1405_v10 = vld [vmem:[%s1483_s28 + $0x1e4] ss:$8 sps:$4 sm:$0xff]  }
  0x24   : > { %711 = vmatprep.subr.bf16.mxu0 %v1423_v1  ;;  %1270 = vmatprep.subr.bf16.mxu1 %v1423_v1 }
  0x27   : > { %712 = vmatpush1.bf16.msra.mxu0 %v1311_v11  ;;  %1286 = vmatpush1.bf16.msra.mxu1 %v1311_v11  ;;  %v1407_v11 = vld [vmem:[%s1483_s28 + $0xe0] ss:$8 sps:$4 sm:$0xff]  }
  0x28   : > { %713 = vmatprep.subr.bf16.mxu0 %v1423_v1  ;;  %1271 = vmatprep.subr.bf16.mxu1 %v1423_v1 }
  0x2b   : > { %714 = vmatpush1.bf16.msra.mxu0 %v1312_v12  ;;  %1287 = vmatpush1.bf16.msra.mxu1 %v1312_v12  ;;  %v1408_v12 = vld [vmem:[%s1483_s28 + $0x1e0] ss:$8 sps:$4 sm:$0xff]  }
  0x2c   : > { %715 = vmatprep.subr.bf16.mxu0 %v1423_v1  ;;  %1272 = vmatprep.subr.bf16.mxu1 %v1423_v1 }
  0x2f   : > { %716 = vmatpush1.bf16.msra.mxu0 %v1313_v13  ;;  %1288 = vmatpush1.bf16.msra.mxu1 %v1313_v13  ;;  %v1409_v13 = vld [vmem:[%s1483_s28 + $0xf4] ss:$8 sps:$4 sm:$0xff]  }
  0x30   : > { %717 = vmatprep.subr.bf16.mxu0 %v1423_v1  ;;  %1273 = vmatprep.subr.bf16.mxu1 %v1423_v1 }
  0x33   : > { %718 = vmatpush1.bf16.msra.mxu0 %v1314_v14  ;;  %1289 = vmatpush1.bf16.msra.mxu1 %v1314_v14  ;;  %v1411_v14 = vld [vmem:[%s1483_s28 + $0x1f4] ss:$8 sps:$4 sm:$0xff]  }
  0x34   : > { %719 = vmatprep.subr.bf16.mxu0 %v1423_v1  ;;  %1274 = vmatprep.subr.bf16.mxu1 %v1423_v1 }
  0x37   : > { %720 = vmatpush1.bf16.msra.mxu0 %v1315_v15  ;;  %1290 = vmatpush1.bf16.msra.mxu1 %v1315_v15  ;;  %v1413_v15 = vld [vmem:[%s1483_s28 + $0xf0] ss:$8 sps:$4 sm:$0xff]  }
  0x38   : > { %721 = vmatprep.subr.bf16.mxu0 %v1423_v1  ;;  %1275 = vmatprep.subr.bf16.mxu1 %v1423_v1 }
  0x3b   : > { %722 = vmatpush1.bf16.msra.mxu0 %v1316_v16  ;;  %1291 = vmatpush1.bf16.msra.mxu1 %v1316_v16  ;;  %v1414_v16 = vld [vmem:[%s1483_s28 + $0x1f0] ss:$8 sps:$4 sm:$0xff]  }
  0x3c   : > { %723 = vmatprep.subr.bf16.mxu0 %v1423_v1  ;;  %1276 = vmatprep.subr.bf16.mxu1 %v1423_v1 }
  0x3f   : > { %724 = vmatpush1.bf16.msra.mxu0 %v1317_v17  ;;  %1292 = vmatpush1.bf16.msra.mxu1 %v1317_v17  ;;  %v1609_v17 = vld [vmem:[%s1751_s2] ss:$0 sm:$0xff] }
  0x40   : > { %725 = vmatprep.subr.bf16.mxu0 %v1423_v1  ;;  %1277 = vmatprep.subr.bf16.mxu1 %v1423_v1  ;;  %v1391_v1 = vld [vmem:[%s1483_s28 + $0xc4] ss:$8 sps:$4 sm:$0xff]   ;;  %s1618_s28 = scalar_lea.vmem %s1752_s3, %s1261_s23 }
  0x43   : > { %726 = vmatpush1.bf16.msra.mxu0 %v1318_v18  ;;  %1293 = vmatpush1.bf16.msra.mxu1 %v1318_v18 }
  0x46   : > { %728 = vmatmul.mubr.bf16.vlgmr.msra.gmra.mrb[0].mxu0 %v1319_v19  ;;  %856 = vmatmul.mubr.bf16.vlgmr.msra.gmra.mrb[0].mxu1 %v1322_v20 }
  0x47   : > { %735 = vmatprep.mubr.bf16.mxu0 %v1325_v21  ;;  %863 = vmatprep.mubr.bf16.mxu1 %v1327_v22 }
  0x4e   : > { %736 = vmatmul.mubr.bf16.gmra.mrb[4].mxu0 %v1329_v23  ;;  %864 = vmatmul.mubr.bf16.gmra.mrb[4].mxu1 %v1330_v24 }
  0x4f   : > { %743 = vmatprep.mubr.bf16.mxu0 %v1331_v25  ;;  %871 = vmatprep.mubr.bf16.mxu1 %v1333_v26 }
  0x56   : > { %744 = vmatmul.mubr.bf16.gmra.mrb[8].mxu0 %v1335_v27  ;;  %872 = vmatmul.mubr.bf16.gmra.mrb[8].mxu1 %v1336_v28 }
  0x57   : > { %751 = vmatprep.mubr.bf16.mxu0 %v1337_v29  ;;  %879 = vmatprep.mubr.bf16.mxu1 %v1339_v30 }
  0x5e   : > { %752 = vmatmul.mubr.bf16.gmra.mrb[12].mxu0 %v1341_v31  ;;  %880 = vmatmul.mubr.bf16.gmra.mrb[12].mxu1 %v1342_v32 }
  0x5f   : > { %759 = vmatprep.mubr.bf16.mxu0 %v1343_v33  ;;  %887 = vmatprep.mubr.bf16.mxu1 %v1345_v34 }
  0x66   : > { %760 = vmatmul.mubr.bf16.gmra.mrb[16].mxu0 %v1347_v35  ;;  %888 = vmatmul.mubr.bf16.gmra.mrb[16].mxu1 %v1348_v36 }
  0x67   : > { %767 = vmatprep.mubr.bf16.mxu0 %v1349_v37  ;;  %895 = vmatprep.mubr.bf16.mxu1 %v1351_v38 }
  0x6e   : > { %768 = vmatmul.mubr.bf16.gmra.mrb[20].mxu0 %v1353_v39  ;;  %896 = vmatmul.mubr.bf16.gmra.mrb[20].mxu1 %v1354_v40 }
  0x6f   : > { %775 = vmatprep.mubr.bf16.mxu0 %v1355_v41  ;;  %903 = vmatprep.mubr.bf16.mxu1 %v1357_v42 }
  0x76   : > { %776 = vmatmul.mubr.bf16.gmra.mrb[24].mxu0 %v1359_v43  ;;  %904 = vmatmul.mubr.bf16.gmra.mrb[24].mxu1 %v1360_v44 }
  0x77   : > { %783 = vmatprep.mubr.bf16.mxu0 %v1361_v45  ;;  %911 = vmatprep.mubr.bf16.mxu1 %v1363_v46 }
  0x7e   : > { %784 = vmatmul.mubr.bf16.gmra.mrb[28].mxu0 %v1365_v47  ;;  %912 = vmatmul.mubr.bf16.gmra.mrb[28].mxu1 %v1366_v48 }
  0x7f   : > { %791 = vmatprep.mubr.bf16.mxu0 %v1367_v49  ;;  %919 = vmatprep.mubr.bf16.mxu1 %v1369_v50 }
  0x86   : > { %792 = vmatmul.mubr.bf16.gmra.mrb[32].mxu0 %v1371_v51  ;;  %920 = vmatmul.mubr.bf16.gmra.mrb[32].mxu1 %v1372_v52 }
  0x87   : > { %799 = vmatprep.mubr.bf16.mxu0 %v1373_v53  ;;  %927 = vmatprep.mubr.bf16.mxu1 %v1375_v54 }
  0x8e   : > { %800 = vmatmul.mubr.bf16.gmra.mrb[36].mxu0 %v1377_v55  ;;  %928 = vmatmul.mubr.bf16.gmra.mrb[36].mxu1 %v1378_v56 }
  0x8f   : > { %807 = vmatprep.mubr.bf16.mxu0 %v1379_v57  ;;  %935 = vmatprep.mubr.bf16.mxu1 %v1381_v58 }
  0x96   : > { %808 = vmatmul.mubr.bf16.gmra.mrb[40].mxu0 %v1383_v59  ;;  %936 = vmatmul.mubr.bf16.gmra.mrb[40].mxu1 %v1384_v60 }
  0x97   : > { %815 = vmatprep.mubr.bf16.mxu0 %v1385_v61  ;;  %943 = vmatprep.mubr.bf16.mxu1 %v1387_v62 }
  0x9e   : > { %816 = vmatmul.mubr.bf16.gmra.mrb[44].mxu0 %v1389_v63  ;;  %944 = vmatmul.mubr.bf16.gmra.mrb[44].mxu1 %v1390_v0 }
  0x9f   : > { %823 = vmatprep.mubr.bf16.mxu0 %v1391_v1  ;;  %951 = vmatprep.mubr.bf16.mxu1 %v1393_v2 }
  0xa6   : > { %824 = vmatmul.mubr.bf16.gmra.mrb[48].mxu0 %v1395_v3  ;;  %952 = vmatmul.mubr.bf16.gmra.mrb[48].mxu1 %v1396_v4 }
  0xa7   : > { %831 = vmatprep.mubr.bf16.mxu0 %v1397_v5  ;;  %959 = vmatprep.mubr.bf16.mxu1 %v1399_v6 }
  0xae   : > { %832 = vmatmul.mubr.bf16.gmra.mrb[52].mxu0 %v1401_v7  ;;  %960 = vmatmul.mubr.bf16.gmra.mrb[52].mxu1 %v1402_v8 }
  0xaf   : > { %839 = vmatprep.mubr.bf16.mxu0 %v1403_v9  ;;  %967 = vmatprep.mubr.bf16.mxu1 %v1405_v10 }
  0xb6   : > { %840 = vmatmul.mubr.bf16.gmra.mrb[56].mxu0 %v1407_v11  ;;  %968 = vmatmul.mubr.bf16.gmra.mrb[56].mxu1 %v1408_v12 }
  0xb7   : > { %847 = vmatprep.mubr.bf16.mxu0 %v1409_v13  ;;  %975 = vmatprep.mubr.bf16.mxu1 %v1411_v14 }
  0xbe   : > { %848 = vmatmul.mubr.bf16.gmra.mrb[60].mxu0 %v1413_v15  ;;  %976 = vmatmul.mubr.bf16.gmra.mrb[60].mxu1 %v1414_v16 }
 0x119   : > { %v729_v18 = vpop.f32.mrb[0].mxu0  ;;  %v857_v19 = vpop.f32.mrb[0].mxu1 }
 0x11a   : > { %v730_v20 = vadd.f32 %v1609_v17, %v729_v18  ;;  %v858_v21 = vadd.f32 %v1609_v17, %v857_v19  ;;  %v731_v22 = vpop.f32.mrb[1].mxu0  ;;  %v859_v23 = vpop.f32.mrb[1].mxu1 }
 0x11b   : > { %v732_v24 = vpop.f32.mrb[2].mxu0  ;;  %v860_v25 = vpop.f32.mrb[2].mxu1 }
 0x11c   : > { %v984_v26 = vmax.f32 %v730_v20, 0.0  ;;  %v1016_v27 = vmax.f32 %v858_v21, 0.0  ;;  %v733_v28 = vadd.f32 %v1609_v17, %v732_v24  ;;  %v861_v29 = vadd.f32 %v1609_v17, %v860_v25  ;;  %v734_v30 = vpop.f32.mrb[3].mxu0  ;;  %v862_v31 = vpop.f32.mrb[3].mxu1 }
 0x11e   : > { %1048 = vst [vmem:[%s1618_s28] sm:$0xff] %v984_v26  ;;  %1080 = vst [vmem:[%s1618_s28 + $0x100] sm:$0xff] %v1016_v27  ;;  %v985_v32 = vmax.f32 %v733_v28, 0.0  ;;  %v1017_v33 = vmax.f32 %v861_v29, 0.0 }
 0x120   : > { %1049 = vst [vmem:[%s1618_s28 + $0x8] sm:$0xff] %v985_v32  ;;  %1081 = vst [vmem:[%s1618_s28 + $0x108] sm:$0xff] %v1017_v33 }
 0x121   : > { %v737_v34 = vpop.f32.mrb[4].mxu0  ;;  %v865_v35 = vpop.f32.mrb[4].mxu1 }
 0x122   : > { %v738_v36 = vadd.f32 %v1609_v17, %v737_v34  ;;  %v866_v37 = vadd.f32 %v1609_v17, %v865_v35  ;;  %v739_v38 = vpop.f32.mrb[5].mxu0  ;;  %v867_v39 = vpop.f32.mrb[5].mxu1 }
 0x123   : > { %v740_v40 = vpop.f32.mrb[6].mxu0  ;;  %v868_v41 = vpop.f32.mrb[6].mxu1 }
 0x124   : > { %v986_v42 = vmax.f32 %v738_v36, 0.0  ;;  %v1018_v43 = vmax.f32 %v866_v37, 0.0  ;;  %v741_v44 = vadd.f32 %v1609_v17, %v740_v40  ;;  %v869_v45 = vadd.f32 %v1609_v17, %v868_v41  ;;  %v742_v46 = vpop.f32.mrb[7].mxu0  ;;  %v870_v47 = vpop.f32.mrb[7].mxu1 }
 0x126   : > { %1050 = vst [vmem:[%s1618_s28 + $0x10] sm:$0xff] %v986_v42  ;;  %1082 = vst [vmem:[%s1618_s28 + $0x110] sm:$0xff] %v1018_v43  ;;  %v987_v48 = vmax.f32 %v741_v44, 0.0  ;;  %v1019_v49 = vmax.f32 %v869_v45, 0.0 }
 0x128   : > { %1051 = vst [vmem:[%s1618_s28 + $0x18] sm:$0xff] %v987_v48  ;;  %1083 = vst [vmem:[%s1618_s28 + $0x118] sm:$0xff] %v1019_v49 }
 0x129   : > { %v745_v50 = vpop.f32.mrb[8].mxu0  ;;  %v873_v51 = vpop.f32.mrb[8].mxu1 }
 0x12a   : > { %v746_v52 = vadd.f32 %v1609_v17, %v745_v50  ;;  %v874_v53 = vadd.f32 %v1609_v17, %v873_v51  ;;  %v747_v54 = vpop.f32.mrb[9].mxu0  ;;  %v875_v55 = vpop.f32.mrb[9].mxu1 }
 0x12b   : > { %v748_v56 = vpop.f32.mrb[10].mxu0  ;;  %v876_v57 = vpop.f32.mrb[10].mxu1 }
 0x12c   : > { %v988_v58 = vmax.f32 %v746_v52, 0.0  ;;  %v1020_v59 = vmax.f32 %v874_v53, 0.0  ;;  %v749_v60 = vadd.f32 %v1609_v17, %v748_v56  ;;  %v877_v61 = vadd.f32 %v1609_v17, %v876_v57  ;;  %v750_v62 = vpop.f32.mrb[11].mxu0  ;;  %v878_v63 = vpop.f32.mrb[11].mxu1 }
 0x12e   : > { %1052 = vst [vmem:[%s1618_s28 + $0x20] sm:$0xff] %v988_v58  ;;  %1084 = vst [vmem:[%s1618_s28 + $0x120] sm:$0xff] %v1020_v59  ;;  %v989_v0 = vmax.f32 %v749_v60, 0.0  ;;  %v1021_v1 = vmax.f32 %v877_v61, 0.0 }
 0x130   : > { %1053 = vst [vmem:[%s1618_s28 + $0x28] sm:$0xff] %v989_v0  ;;  %1085 = vst [vmem:[%s1618_s28 + $0x128] sm:$0xff] %v1021_v1 }
 0x131   : > { %v753_v2 = vpop.f32.mrb[12].mxu0  ;;  %v881_v3 = vpop.f32.mrb[12].mxu1 }
 0x132   : > { %v754_v4 = vadd.f32 %v1609_v17, %v753_v2  ;;  %v882_v5 = vadd.f32 %v1609_v17, %v881_v3  ;;  %v755_v6 = vpop.f32.mrb[13].mxu0  ;;  %v883_v7 = vpop.f32.mrb[13].mxu1 }
 0x133   : > { %v756_v8 = vpop.f32.mrb[14].mxu0  ;;  %v884_v9 = vpop.f32.mrb[14].mxu1 }
 0x134   : > { %v990_v10 = vmax.f32 %v754_v4, 0.0  ;;  %v1022_v11 = vmax.f32 %v882_v5, 0.0  ;;  %v757_v12 = vadd.f32 %v1609_v17, %v756_v8  ;;  %v885_v13 = vadd.f32 %v1609_v17, %v884_v9  ;;  %v758_v14 = vpop.f32.mrb[15].mxu0  ;;  %v886_v15 = vpop.f32.mrb[15].mxu1 }
 0x136   : > { %1054 = vst [vmem:[%s1618_s28 + $0x30] sm:$0xff] %v990_v10  ;;  %1086 = vst [vmem:[%s1618_s28 + $0x130] sm:$0xff] %v1022_v11  ;;  %v991_v16 = vmax.f32 %v757_v12, 0.0  ;;  %v1023_v18 = vmax.f32 %v885_v13, 0.0 }
 0x138   : > { %1055 = vst [vmem:[%s1618_s28 + $0x38] sm:$0xff] %v991_v16  ;;  %1087 = vst [vmem:[%s1618_s28 + $0x138] sm:$0xff] %v1023_v18 }
 0x139   : > { %v761_v19 = vpop.f32.mrb[16].mxu0  ;;  %v889_v20 = vpop.f32.mrb[16].mxu1 }
 0x13a   : > { %v762_v21 = vadd.f32 %v1609_v17, %v761_v19  ;;  %v890_v22 = vadd.f32 %v1609_v17, %v889_v20  ;;  %v763_v23 = vpop.f32.mrb[17].mxu0  ;;  %v891_v24 = vpop.f32.mrb[17].mxu1 }
 0x13b   : > { %v764_v25 = vpop.f32.mrb[18].mxu0  ;;  %v892_v26 = vpop.f32.mrb[18].mxu1 }
 0x13c   : > { %v992_v27 = vmax.f32 %v762_v21, 0.0  ;;  %v1024_v28 = vmax.f32 %v890_v22, 0.0  ;;  %v765_v29 = vadd.f32 %v1609_v17, %v764_v25  ;;  %v893_v30 = vadd.f32 %v1609_v17, %v892_v26  ;;  %v766_v31 = vpop.f32.mrb[19].mxu0  ;;  %v894_v32 = vpop.f32.mrb[19].mxu1 }
 0x13e   : > { %1056 = vst [vmem:[%s1618_s28 + $0x40] sm:$0xff] %v992_v27  ;;  %1088 = vst [vmem:[%s1618_s28 + $0x140] sm:$0xff] %v1024_v28  ;;  %v993_v33 = vmax.f32 %v765_v29, 0.0  ;;  %v1025_v34 = vmax.f32 %v893_v30, 0.0 }
 0x140   : > { %1057 = vst [vmem:[%s1618_s28 + $0x48] sm:$0xff] %v993_v33  ;;  %1089 = vst [vmem:[%s1618_s28 + $0x148] sm:$0xff] %v1025_v34 }
 0x141   : > { %v769_v35 = vpop.f32.mrb[20].mxu0  ;;  %v897_v36 = vpop.f32.mrb[20].mxu1 }
 0x142   : > { %v770_v37 = vadd.f32 %v1609_v17, %v769_v35  ;;  %v898_v38 = vadd.f32 %v1609_v17, %v897_v36  ;;  %v771_v39 = vpop.f32.mrb[21].mxu0  ;;  %v899_v40 = vpop.f32.mrb[21].mxu1 }
 0x143   : > { %v772_v41 = vpop.f32.mrb[22].mxu0  ;;  %v900_v42 = vpop.f32.mrb[22].mxu1 }
 0x144   : > { %v994_v43 = vmax.f32 %v770_v37, 0.0  ;;  %v1026_v44 = vmax.f32 %v898_v38, 0.0  ;;  %v773_v45 = vadd.f32 %v1609_v17, %v772_v41  ;;  %v901_v46 = vadd.f32 %v1609_v17, %v900_v42  ;;  %v774_v47 = vpop.f32.mrb[23].mxu0  ;;  %v902_v48 = vpop.f32.mrb[23].mxu1 }
 0x146   : > { %1058 = vst [vmem:[%s1618_s28 + $0x50] sm:$0xff] %v994_v43  ;;  %1090 = vst [vmem:[%s1618_s28 + $0x150] sm:$0xff] %v1026_v44  ;;  %v995_v49 = vmax.f32 %v773_v45, 0.0  ;;  %v1027_v50 = vmax.f32 %v901_v46, 0.0 }
 0x148   : > { %1059 = vst [vmem:[%s1618_s28 + $0x58] sm:$0xff] %v995_v49  ;;  %1091 = vst [vmem:[%s1618_s28 + $0x158] sm:$0xff] %v1027_v50 }
 0x149   : > { %v777_v51 = vpop.f32.mrb[24].mxu0  ;;  %v905_v52 = vpop.f32.mrb[24].mxu1 }
 0x14a   : > { %v778_v53 = vadd.f32 %v1609_v17, %v777_v51  ;;  %v906_v54 = vadd.f32 %v1609_v17, %v905_v52  ;;  %v779_v55 = vpop.f32.mrb[25].mxu0  ;;  %v907_v56 = vpop.f32.mrb[25].mxu1 }
 0x14b   : > { %v780_v57 = vpop.f32.mrb[26].mxu0  ;;  %v908_v58 = vpop.f32.mrb[26].mxu1 }
 0x14c   : > { %v996_v59 = vmax.f32 %v778_v53, 0.0  ;;  %v1028_v60 = vmax.f32 %v906_v54, 0.0  ;;  %v781_v61 = vadd.f32 %v1609_v17, %v780_v57  ;;  %v909_v62 = vadd.f32 %v1609_v17, %v908_v58  ;;  %v782_v63 = vpop.f32.mrb[27].mxu0  ;;  %v910_v0 = vpop.f32.mrb[27].mxu1 }
 0x14e   : > { %1060 = vst [vmem:[%s1618_s28 + $0x60] sm:$0xff] %v996_v59  ;;  %1092 = vst [vmem:[%s1618_s28 + $0x160] sm:$0xff] %v1028_v60  ;;  %v997_v1 = vmax.f32 %v781_v61, 0.0  ;;  %v1029_v2 = vmax.f32 %v909_v62, 0.0 }
 0x150   : > { %1061 = vst [vmem:[%s1618_s28 + $0x68] sm:$0xff] %v997_v1  ;;  %1093 = vst [vmem:[%s1618_s28 + $0x168] sm:$0xff] %v1029_v2 }
 0x151   : > { %v785_v3 = vpop.f32.mrb[28].mxu0  ;;  %v913_v4 = vpop.f32.mrb[28].mxu1 }
 0x152   : > { %v786_v5 = vadd.f32 %v1609_v17, %v785_v3  ;;  %v914_v6 = vadd.f32 %v1609_v17, %v913_v4  ;;  %v787_v7 = vpop.f32.mrb[29].mxu0  ;;  %v915_v8 = vpop.f32.mrb[29].mxu1 }
 0x153   : > { %v788_v9 = vpop.f32.mrb[30].mxu0  ;;  %v916_v10 = vpop.f32.mrb[30].mxu1 }
 0x154   : > { %v998_v11 = vmax.f32 %v786_v5, 0.0  ;;  %v1030_v12 = vmax.f32 %v914_v6, 0.0  ;;  %v789_v13 = vadd.f32 %v1609_v17, %v788_v9  ;;  %v917_v14 = vadd.f32 %v1609_v17, %v916_v10  ;;  %v790_v15 = vpop.f32.mrb[31].mxu0  ;;  %v918_v16 = vpop.f32.mrb[31].mxu1 }
 0x156   : > { %1062 = vst [vmem:[%s1618_s28 + $0x70] sm:$0xff] %v998_v11  ;;  %1094 = vst [vmem:[%s1618_s28 + $0x170] sm:$0xff] %v1030_v12  ;;  %v999_v18 = vmax.f32 %v789_v13, 0.0  ;;  %v1031_v19 = vmax.f32 %v917_v14, 0.0 }
 0x158   : > { %1063 = vst [vmem:[%s1618_s28 + $0x78] sm:$0xff] %v999_v18  ;;  %1095 = vst [vmem:[%s1618_s28 + $0x178] sm:$0xff] %v1031_v19 }
 0x159   : > { %v793_v20 = vpop.f32.mrb[32].mxu0  ;;  %v921_v21 = vpop.f32.mrb[32].mxu1 }
 0x15a   : > { %v794_v22 = vadd.f32 %v1609_v17, %v793_v20  ;;  %v922_v23 = vadd.f32 %v1609_v17, %v921_v21  ;;  %v795_v24 = vpop.f32.mrb[33].mxu0  ;;  %v923_v25 = vpop.f32.mrb[33].mxu1 }
 0x15b   : > { %v796_v26 = vpop.f32.mrb[34].mxu0  ;;  %v924_v27 = vpop.f32.mrb[34].mxu1 }
 0x15c   : > { %v1000_v28 = vmax.f32 %v794_v22, 0.0  ;;  %v1032_v29 = vmax.f32 %v922_v23, 0.0  ;;  %v797_v30 = vadd.f32 %v1609_v17, %v796_v26  ;;  %v925_v31 = vadd.f32 %v1609_v17, %v924_v27  ;;  %v798_v32 = vpop.f32.mrb[35].mxu0  ;;  %v926_v33 = vpop.f32.mrb[35].mxu1 }
 0x15e   : > { %1064 = vst [vmem:[%s1618_s28 + $0x80] sm:$0xff] %v1000_v28  ;;  %1096 = vst [vmem:[%s1618_s28 + $0x180] sm:$0xff] %v1032_v29  ;;  %v1001_v34 = vmax.f32 %v797_v30, 0.0  ;;  %v1033_v35 = vmax.f32 %v925_v31, 0.0 }
 0x160   : > { %1065 = vst [vmem:[%s1618_s28 + $0x88] sm:$0xff] %v1001_v34  ;;  %1097 = vst [vmem:[%s1618_s28 + $0x188] sm:$0xff] %v1033_v35 }
 0x161   : > { %v801_v36 = vpop.f32.mrb[36].mxu0  ;;  %v929_v37 = vpop.f32.mrb[36].mxu1 }
 0x162   : > { %v802_v38 = vadd.f32 %v1609_v17, %v801_v36  ;;  %v930_v39 = vadd.f32 %v1609_v17, %v929_v37  ;;  %v803_v40 = vpop.f32.mrb[37].mxu0  ;;  %v931_v41 = vpop.f32.mrb[37].mxu1 }
 0x163   : > { %v804_v42 = vpop.f32.mrb[38].mxu0  ;;  %v932_v43 = vpop.f32.mrb[38].mxu1 }
 0x164   : > { %v1002_v44 = vmax.f32 %v802_v38, 0.0  ;;  %v1034_v45 = vmax.f32 %v930_v39, 0.0  ;;  %v805_v46 = vadd.f32 %v1609_v17, %v804_v42  ;;  %v933_v47 = vadd.f32 %v1609_v17, %v932_v43  ;;  %v806_v48 = vpop.f32.mrb[39].mxu0  ;;  %v934_v49 = vpop.f32.mrb[39].mxu1 }
 0x166   : > { %1066 = vst [vmem:[%s1618_s28 + $0x90] sm:$0xff] %v1002_v44  ;;  %1098 = vst [vmem:[%s1618_s28 + $0x190] sm:$0xff] %v1034_v45  ;;  %v1003_v50 = vmax.f32 %v805_v46, 0.0  ;;  %v1035_v51 = vmax.f32 %v933_v47, 0.0 }
 0x168   : > { %1067 = vst [vmem:[%s1618_s28 + $0x98] sm:$0xff] %v1003_v50  ;;  %1099 = vst [vmem:[%s1618_s28 + $0x198] sm:$0xff] %v1035_v51 }
 0x169   : > { %v809_v52 = vpop.f32.mrb[40].mxu0  ;;  %v937_v53 = vpop.f32.mrb[40].mxu1 }
 0x16a   : > { %v810_v54 = vadd.f32 %v1609_v17, %v809_v52  ;;  %v938_v55 = vadd.f32 %v1609_v17, %v937_v53  ;;  %v811_v56 = vpop.f32.mrb[41].mxu0  ;;  %v939_v57 = vpop.f32.mrb[41].mxu1 }
 0x16b   : > { %v812_v58 = vpop.f32.mrb[42].mxu0  ;;  %v940_v59 = vpop.f32.mrb[42].mxu1 }
 0x16c   : > { %v1004_v60 = vmax.f32 %v810_v54, 0.0  ;;  %v1036_v61 = vmax.f32 %v938_v55, 0.0  ;;  %v813_v62 = vadd.f32 %v1609_v17, %v812_v58  ;;  %v941_v63 = vadd.f32 %v1609_v17, %v940_v59  ;;  %v814_v0 = vpop.f32.mrb[43].mxu0  ;;  %v942_v1 = vpop.f32.mrb[43].mxu1 }
 0x16e   : > { %1068 = vst [vmem:[%s1618_s28 + $0xa0] sm:$0xff] %v1004_v60  ;;  %1100 = vst [vmem:[%s1618_s28 + $0x1a0] sm:$0xff] %v1036_v61  ;;  %v1005_v2 = vmax.f32 %v813_v62, 0.0  ;;  %v1037_v3 = vmax.f32 %v941_v63, 0.0 }
 0x170   : > { %1069 = vst [vmem:[%s1618_s28 + $0xa8] sm:$0xff] %v1005_v2  ;;  %1101 = vst [vmem:[%s1618_s28 + $0x1a8] sm:$0xff] %v1037_v3 }
 0x171   : > { %v817_v4 = vpop.f32.mrb[44].mxu0  ;;  %v945_v5 = vpop.f32.mrb[44].mxu1 }
 0x172   : > { %v818_v6 = vadd.f32 %v1609_v17, %v817_v4  ;;  %v946_v7 = vadd.f32 %v1609_v17, %v945_v5  ;;  %v819_v8 = vpop.f32.mrb[45].mxu0  ;;  %v947_v9 = vpop.f32.mrb[45].mxu1 }
 0x173   : > { %v820_v10 = vpop.f32.mrb[46].mxu0  ;;  %v948_v11 = vpop.f32.mrb[46].mxu1 }
 0x174   : > { %v1006_v12 = vmax.f32 %v818_v6, 0.0  ;;  %v1038_v13 = vmax.f32 %v946_v7, 0.0  ;;  %v821_v14 = vadd.f32 %v1609_v17, %v820_v10  ;;  %v949_v15 = vadd.f32 %v1609_v17, %v948_v11  ;;  %v822_v16 = vpop.f32.mrb[47].mxu0  ;;  %v950_v18 = vpop.f32.mrb[47].mxu1 }
 0x176   : > { %1070 = vst [vmem:[%s1618_s28 + $0xb0] sm:$0xff] %v1006_v12  ;;  %1102 = vst [vmem:[%s1618_s28 + $0x1b0] sm:$0xff] %v1038_v13  ;;  %v1007_v19 = vmax.f32 %v821_v14, 0.0  ;;  %v1039_v20 = vmax.f32 %v949_v15, 0.0 }
 0x178   : > { %1071 = vst [vmem:[%s1618_s28 + $0xb8] sm:$0xff] %v1007_v19  ;;  %1103 = vst [vmem:[%s1618_s28 + $0x1b8] sm:$0xff] %v1039_v20 }
 0x179   : > { %v825_v21 = vpop.f32.mrb[48].mxu0  ;;  %v953_v22 = vpop.f32.mrb[48].mxu1 }
 0x17a   : > { %v826_v23 = vadd.f32 %v1609_v17, %v825_v21  ;;  %v954_v24 = vadd.f32 %v1609_v17, %v953_v22  ;;  %v827_v25 = vpop.f32.mrb[49].mxu0  ;;  %v955_v26 = vpop.f32.mrb[49].mxu1 }
 0x17b   : > { %v828_v27 = vpop.f32.mrb[50].mxu0  ;;  %v956_v28 = vpop.f32.mrb[50].mxu1 }
 0x17c   : > { %v1008_v29 = vmax.f32 %v826_v23, 0.0  ;;  %v1040_v30 = vmax.f32 %v954_v24, 0.0  ;;  %v829_v31 = vadd.f32 %v1609_v17, %v828_v27  ;;  %v957_v32 = vadd.f32 %v1609_v17, %v956_v28  ;;  %v830_v33 = vpop.f32.mrb[51].mxu0  ;;  %v958_v34 = vpop.f32.mrb[51].mxu1 }
 0x17e   : > { %1072 = vst [vmem:[%s1618_s28 + $0xc0] sm:$0xff] %v1008_v29  ;;  %1104 = vst [vmem:[%s1618_s28 + $0x1c0] sm:$0xff] %v1040_v30  ;;  %v1009_v35 = vmax.f32 %v829_v31, 0.0  ;;  %v1041_v36 = vmax.f32 %v957_v32, 0.0 }
 0x180   : > { %1073 = vst [vmem:[%s1618_s28 + $0xc8] sm:$0xff] %v1009_v35  ;;  %1105 = vst [vmem:[%s1618_s28 + $0x1c8] sm:$0xff] %v1041_v36 }
 0x181   : > { %v833_v37 = vpop.f32.mrb[52].mxu0  ;;  %v961_v38 = vpop.f32.mrb[52].mxu1 }
 0x182   : > { %v834_v39 = vadd.f32 %v1609_v17, %v833_v37  ;;  %v962_v40 = vadd.f32 %v1609_v17, %v961_v38  ;;  %v835_v41 = vpop.f32.mrb[53].mxu0  ;;  %v963_v42 = vpop.f32.mrb[53].mxu1 }
 0x183   : > { %v836_v43 = vpop.f32.mrb[54].mxu0  ;;  %v964_v44 = vpop.f32.mrb[54].mxu1 }
 0x184   : > { %v1010_v45 = vmax.f32 %v834_v39, 0.0  ;;  %v1042_v46 = vmax.f32 %v962_v40, 0.0  ;;  %v837_v47 = vadd.f32 %v1609_v17, %v836_v43  ;;  %v965_v48 = vadd.f32 %v1609_v17, %v964_v44  ;;  %v838_v49 = vpop.f32.mrb[55].mxu0  ;;  %v966_v50 = vpop.f32.mrb[55].mxu1 }
 0x186   : > { %1074 = vst [vmem:[%s1618_s28 + $0xd0] sm:$0xff] %v1010_v45  ;;  %1106 = vst [vmem:[%s1618_s28 + $0x1d0] sm:$0xff] %v1042_v46  ;;  %v1011_v51 = vmax.f32 %v837_v47, 0.0  ;;  %v1043_v52 = vmax.f32 %v965_v48, 0.0 }
 0x188   : > { %1075 = vst [vmem:[%s1618_s28 + $0xd8] sm:$0xff] %v1011_v51  ;;  %1107 = vst [vmem:[%s1618_s28 + $0x1d8] sm:$0xff] %v1043_v52 }
 0x189   : > { %v841_v53 = vpop.f32.mrb[56].mxu0  ;;  %v969_v54 = vpop.f32.mrb[56].mxu1 }
 0x18a   : > { %v842_v55 = vadd.f32 %v1609_v17, %v841_v53  ;;  %v970_v56 = vadd.f32 %v1609_v17, %v969_v54  ;;  %v843_v57 = vpop.f32.mrb[57].mxu0  ;;  %v971_v58 = vpop.f32.mrb[57].mxu1 }
 0x18b   : > { %v844_v59 = vpop.f32.mrb[58].mxu0  ;;  %v972_v60 = vpop.f32.mrb[58].mxu1 }
 0x18c   : > { %v1012_v61 = vmax.f32 %v842_v55, 0.0  ;;  %v1044_v62 = vmax.f32 %v970_v56, 0.0  ;;  %v845_v63 = vadd.f32 %v1609_v17, %v844_v59  ;;  %v973_v0 = vadd.f32 %v1609_v17, %v972_v60  ;;  %v846_v1 = vpop.f32.mrb[59].mxu0  ;;  %v974_v2 = vpop.f32.mrb[59].mxu1 }
 0x18e   : > { %1076 = vst [vmem:[%s1618_s28 + $0xe0] sm:$0xff] %v1012_v61  ;;  %1108 = vst [vmem:[%s1618_s28 + $0x1e0] sm:$0xff] %v1044_v62  ;;  %v1013_v3 = vmax.f32 %v845_v63, 0.0  ;;  %v1045_v4 = vmax.f32 %v973_v0, 0.0 }
 0x190   : > { %1077 = vst [vmem:[%s1618_s28 + $0xe8] sm:$0xff] %v1013_v3  ;;  %1109 = vst [vmem:[%s1618_s28 + $0x1e8] sm:$0xff] %v1045_v4 }
 0x191   : > { %v849_v5 = vpop.f32.mrb[60].mxu0  ;;  %v977_v6 = vpop.f32.mrb[60].mxu1 }
 0x192   : > { %v850_v7 = vadd.f32 %v1609_v17, %v849_v5  ;;  %v978_v8 = vadd.f32 %v1609_v17, %v977_v6  ;;  %v851_v9 = vpop.f32.mrb[61].mxu0  ;;  %v979_v10 = vpop.f32.mrb[61].mxu1 }
 0x193   : > { %v852_v11 = vpop.f32.mrb[62].mxu0  ;;  %v980_v12 = vpop.f32.mrb[62].mxu1 }
 0x194   : > { %v1014_v13 = vmax.f32 %v850_v7, 0.0  ;;  %v1046_v14 = vmax.f32 %v978_v8, 0.0  ;;  %v853_v15 = vadd.f32 %v1609_v17, %v852_v11  ;;  %v981_v16 = vadd.f32 %v1609_v17, %v980_v12  ;;  %v854_v18 = vpop.f32.mrb[63].mxu0  ;;  %v982_v19 = vpop.f32.mrb[63].mxu1 }
 0x196   : > { %1078 = vst [vmem:[%s1618_s28 + $0xf0] sm:$0xff] %v1014_v13  ;;  %1110 = vst [vmem:[%s1618_s28 + $0x1f0] sm:$0xff] %v1046_v14  ;;  %v1015_v20 = vmax.f32 %v853_v15, 0.0  ;;  %v1047_v21 = vmax.f32 %v981_v16, 0.0 }
 0x198   : > { %1079 = vst [vmem:[%s1618_s28 + $0xf8] sm:$0xff] %v1015_v20  ;;  %1111 = vst [vmem:[%s1618_s28 + $0x1f8] sm:$0xff] %v1047_v21 }
 0x199 PF: > { %s13_s12 = sadd.s32 1, %s1421_s12  }
 0x19a   : > { %p10_p4 = scmp.ge.s32.totalorder %s13_s12, 6  }
 0x19c   :  { %12 = sbr.rel (!%p10_p4) target bundleno = 1 (0x1), region = 62 }

// kernel: mousenet_3d_forward.13
= control target key start
LH: loop header
LB: loop body
LE: loop exit
PB: predicated region body
PF: predicated region fallthrough
CT: control target
= control target key end

     0   :  { %s805_s12 = smov 0   ;;  %s939_s0 = inlined_call_operand.vmem [shape: bf16[512,128], index: 0, kind: input, shape index: {}]   ;;  %s940_s1 = inlined_call_operand.vmem [shape: bf16[128,128], index: 1, kind: input, shape index: {}]   ;;  %s941_s2 = inlined_call_operand.vmem [shape: f32[8,128], index: 2, kind: input, shape index: {}]   ;;  %s942_s3 = inlined_call_operand.vmem [shape: f32[512,128], index: 3, kind: output, shape index: {}]  }
   0x1 LB: > { %s621_s13 = sadd.s32 4294967295, %s783_s12   ;;  %p625_p0 = scmp.ge.s32.totalorder %s783_s12, 1  ;;  %s783_s12 = sphi %s805_s12, %s13_s12  }
   0x2   : > { %p138_p1 = scmp.lt.s32.totalorder %s783_s12, 3 }
   0x4   : > { %p139_p2 = pnand %p625_p0, %p138_p1 }
   0x5   : > { %v753_v0 = vld [vmem:[%s940_s1] sm:$0xff] (!%p139_p2)   ;;  %s626_s16 = sshll.u32 (!%p139_p2), %s621_s13, 5  ;;  %v754_v1 = vld [vmem:[%s940_s1 + $0x8] sm:$0xff] (!%p139_p2)   ;;  %v755_v2 = vld [vmem:[%s940_s1 + $0x10] sm:$0xff] (!%p139_p2)  }
   0x6   : > { %142 = sbr.rel (%p139_p2) target bundleno = 280 (0x118), region = 32  ;;  %p163_p3 = scmp.lt.s32.totalorder (!%p139_p2), %s626_s16, 63  ;;  %681 = vmatprep.subr.bf16.mxu0 (!%p139_p2), %v753_v0  ;;  %729 = vmatprep.subr.bf16.mxu1 (!%p139_p2), %v753_v0  ;;  %v756_v3 = vld [vmem:[%s940_s1 + $0x18] sm:$0xff] (!%p139_p2)   ;;  %v757_v6 = vld [vmem:[%s940_s1 + $0x20] sm:$0xff] (!%p139_p2)   ;;  %v758_v7 = vld [vmem:[%s940_s1 + $0x28] sm:$0xff] (!%p139_p2)  }
   0x7   : > { %682 = vmatpush3.bf16.msra.mxu0 (!%p139_p2), %v753_v0  ;;  %737 = vmatpush3.bf16.msra.mxu1 (!%p139_p2), %v753_v0  ;;  %v759_v8 = vld [vmem:[%s940_s1 + $0x30] sm:$0xff] (!%p139_p2)   ;;  %v760_v9 = vld [vmem:[%s940_s1 + $0x38] sm:$0xff] (!%p139_p2)   ;;  %v865_v24 = vld [vmem:[%s941_s2] ss:$0 sm:$0xff] (!%p139_p2) }
   0x8   : > { %683 = vmatprep.subr.bf16.mxu0 (!%p139_p2), %v754_v1  ;;  %730 = vmatprep.subr.bf16.mxu1 (!%p139_p2), %v754_v1 }
   0xb   : > { %684 = vmatpush3.bf16.msra.mxu0 (!%p139_p2), %v754_v1  ;;  %738 = vmatpush3.bf16.msra.mxu1 (!%p139_p2), %v754_v1 }
   0xc   : > { %685 = vmatprep.subr.bf16.mxu0 (!%p139_p2), %v755_v2  ;;  %731 = vmatprep.subr.bf16.mxu1 (!%p139_p2), %v755_v2 }
   0xd   : > { %s944_s16 = smov (!%p163_p3, %s626_s16), 63 }
   0xe   : > { %s627_s21 = sshll.u32 %s944_s16, 2  ;;  %s629_s8 = sshll.u32 %s944_s16, 3 }
   0xf   : > { %s828_s24 = scalar_lea.vmem %s939_s0, %s627_s21  ;;  %686 = vmatpush3.bf16.msra.mxu0 %v755_v2  ;;  %739 = vmatpush3.bf16.msra.mxu1 %v755_v2  ;;  %s870_s14 = scalar_lea.vmem %s942_s3, %s629_s8 }
  0x10   : > { %v761_v4 = vld [vmem:[%s828_s24] sm:$0xff]   ;;  %687 = vmatprep.subr.bf16.mxu0 %v756_v3  ;;  %732 = vmatprep.subr.bf16.mxu1 %v756_v3  ;;  %v763_v10 = vld [vmem:[%s828_s24 + $0x8] sm:$0xff]   ;;  %v765_v12 = vld [vmem:[%s828_s24 + $0x10] sm:$0xff]  }
  0x11   : > { %v762_v5 = vld [vmem:[%s828_s24 + $0x40] sm:$0xff]   ;;  %697 = vmatprep.mubr.bf16.mxu0 %v761_v4  ;;  %v764_v11 = vld [vmem:[%s828_s24 + $0x48] sm:$0xff]   ;;  %v766_v13 = vld [vmem:[%s828_s24 + $0x50] sm:$0xff]  }
  0x12   : > { %713 = vmatprep.mubr.bf16.mxu1 %v762_v5  ;;  %v767_v14 = vld [vmem:[%s828_s24 + $0x18] sm:$0xff]   ;;  %v769_v16 = vld [vmem:[%s828_s24 + $0x20] sm:$0xff]   ;;  %v771_v18 = vld [vmem:[%s828_s24 + $0x28] sm:$0xff]  }
  0x13   : > { %688 = vmatpush3.bf16.msra.mxu0 %v756_v3  ;;  %740 = vmatpush3.bf16.msra.mxu1 %v756_v3  ;;  %v768_v15 = vld [vmem:[%s828_s24 + $0x58] sm:$0xff]   ;;  %v770_v17 = vld [vmem:[%s828_s24 + $0x60] sm:$0xff]   ;;  %v772_v19 = vld [vmem:[%s828_s24 + $0x68] sm:$0xff]  }
  0x14   : > { %689 = vmatprep.subr.bf16.mxu0 %v757_v6  ;;  %733 = vmatprep.subr.bf16.mxu1 %v757_v6  ;;  %v773_v20 = vld [vmem:[%s828_s24 + $0x30] sm:$0xff]   ;;  %v775_v22 = vld [vmem:[%s828_s24 + $0x38] sm:$0xff]  }
  0x15   : > { %v774_v21 = vld [vmem:[%s828_s24 + $0x70] sm:$0xff]   ;;  %v776_v23 = vld [vmem:[%s828_s24 + $0x78] sm:$0xff]  }
  0x17   : > { %690 = vmatpush3.bf16.msra.mxu0 %v757_v6  ;;  %741 = vmatpush3.bf16.msra.mxu1 %v757_v6 }
  0x18   : > { %691 = vmatprep.subr.bf16.mxu0 %v758_v7  ;;  %734 = vmatprep.subr.bf16.mxu1 %v758_v7 }
  0x1b   : > { %692 = vmatpush3.bf16.msra.mxu0 %v758_v7  ;;  %742 = vmatpush3.bf16.msra.mxu1 %v758_v7 }
  0x1c   : > { %693 = vmatprep.subr.bf16.mxu0 %v759_v8  ;;  %735 = vmatprep.subr.bf16.mxu1 %v759_v8 }
  0x1f   : > { %694 = vmatpush3.bf16.msra.mxu0 %v759_v8  ;;  %743 = vmatpush3.bf16.msra.mxu1 %v759_v8 }
  0x20   : > { %695 = vmatprep.subr.bf16.mxu0 %v760_v9  ;;  %736 = vmatprep.subr.bf16.mxu1 %v760_v9 }
  0x23   : > { %696 = vmatpush3.bf16.msra.mxu0 %v760_v9  ;;  %744 = vmatpush3.bf16.msra.mxu1 %v760_v9 }
  0x26   : > { %698 = vmatmul.mubr.bf16.vlgmr.msra.gmra.mrb[0].mxu0 %v763_v10  ;;  %714 = vmatmul.mubr.bf16.vlgmr.msra.gmra.mrb[0].mxu1 %v764_v11 }
  0x27   : > { %701 = vmatprep.mubr.bf16.mxu0 %v765_v12  ;;  %717 = vmatprep.mubr.bf16.mxu1 %v766_v13 }
  0x2e   : > { %702 = vmatmul.mubr.bf16.gmra.mrb[4].mxu0 %v767_v14  ;;  %718 = vmatmul.mubr.bf16.gmra.mrb[4].mxu1 %v768_v15 }
  0x2f   : > { %705 = vmatprep.mubr.bf16.mxu0 %v769_v16  ;;  %721 = vmatprep.mubr.bf16.mxu1 %v770_v17 }
  0x36   : > { %706 = vmatmul.mubr.bf16.gmra.mrb[8].mxu0 %v771_v18  ;;  %722 = vmatmul.mubr.bf16.gmra.mrb[8].mxu1 %v772_v19 }
  0x37   : > { %709 = vmatprep.mubr.bf16.mxu0 %v773_v20  ;;  %725 = vmatprep.mubr.bf16.mxu1 %v774_v21 }
  0x3e   : > { %710 = vmatmul.mubr.bf16.gmra.mrb[12].mxu0 %v775_v22  ;;  %726 = vmatmul.mubr.bf16.gmra.mrb[12].mxu1 %v776_v23 }
  0xf9   : > { %v699_v25 = vpop.f32.mrb[0].mxu0  ;;  %v715_v26 = vpop.f32.mrb[0].mxu1 }
  0xfa   : > { %v415_v27 = vadd.f32 %v699_v25, %v865_v24  ;;  %v479_v28 = vadd.f32 %v715_v26, %v865_v24  ;;  %v406_v29 = vpop.f32.mrb[1].mxu0  ;;  %v470_v30 = vpop.f32.mrb[1].mxu1 }
  0xfb   : > { %v407_v31 = vadd.f32 %v865_v24, %v406_v29  ;;  %v471_v32 = vadd.f32 %v865_v24, %v470_v30  ;;  %v700_v33 = vpop.f32.mrb[2].mxu0  ;;  %v716_v34 = vpop.f32.mrb[2].mxu1 }
  0xfc   : > { %535 = vst [vmem:[%s870_s14 + $0x10] sm:$0xff] %v415_v27  ;;  %551 = vst [vmem:[%s870_s14 + $0x90] sm:$0xff] %v479_v28  ;;  %v418_v35 = vadd.f32 %v700_v33, %v865_v24  ;;  %v482_v36 = vadd.f32 %v716_v34, %v865_v24  ;;  %v409_v37 = vpop.f32.mrb[3].mxu0  ;;  %v473_v38 = vpop.f32.mrb[3].mxu1 }
  0xfd   : > { %533 = vst [vmem:[%s870_s14] sm:$0xff] %v407_v31  ;;  %549 = vst [vmem:[%s870_s14 + $0x80] sm:$0xff] %v471_v32  ;;  %v410_v39 = vadd.f32 %v865_v24, %v409_v37  ;;  %v474_v40 = vadd.f32 %v865_v24, %v473_v38 }
  0xfe   : > { %536 = vst [vmem:[%s870_s14 + $0x18] sm:$0xff] %v418_v35  ;;  %552 = vst [vmem:[%s870_s14 + $0x98] sm:$0xff] %v482_v36 }
  0xff   : > { %534 = vst [vmem:[%s870_s14 + $0x8] sm:$0xff] %v410_v39  ;;  %550 = vst [vmem:[%s870_s14 + $0x88] sm:$0xff] %v474_v40 }
 0x101   : > { %v703_v41 = vpop.f32.mrb[4].mxu0  ;;  %v719_v42 = vpop.f32.mrb[4].mxu1 }
 0x102   : > { %v431_v43 = vadd.f32 %v703_v41, %v865_v24  ;;  %v495_v44 = vadd.f32 %v719_v42, %v865_v24  ;;  %v422_v45 = vpop.f32.mrb[5].mxu0  ;;  %v486_v46 = vpop.f32.mrb[5].mxu1 }
 0x103   : > { %v423_v47 = vadd.f32 %v865_v24, %v422_v45  ;;  %v487_v48 = vadd.f32 %v865_v24, %v486_v46  ;;  %v704_v49 = vpop.f32.mrb[6].mxu0  ;;  %v720_v50 = vpop.f32.mrb[6].mxu1 }
 0x104   : > { %539 = vst [vmem:[%s870_s14 + $0x30] sm:$0xff] %v431_v43  ;;  %555 = vst [vmem:[%s870_s14 + $0xb0] sm:$0xff] %v495_v44  ;;  %v434_v51 = vadd.f32 %v704_v49, %v865_v24  ;;  %v498_v52 = vadd.f32 %v720_v50, %v865_v24  ;;  %v425_v53 = vpop.f32.mrb[7].mxu0  ;;  %v489_v54 = vpop.f32.mrb[7].mxu1 }
 0x105   : > { %537 = vst [vmem:[%s870_s14 + $0x20] sm:$0xff] %v423_v47  ;;  %553 = vst [vmem:[%s870_s14 + $0xa0] sm:$0xff] %v487_v48  ;;  %v426_v55 = vadd.f32 %v865_v24, %v425_v53  ;;  %v490_v56 = vadd.f32 %v865_v24, %v489_v54 }
 0x106   : > { %540 = vst [vmem:[%s870_s14 + $0x38] sm:$0xff] %v434_v51  ;;  %556 = vst [vmem:[%s870_s14 + $0xb8] sm:$0xff] %v498_v52 }
 0x107   : > { %538 = vst [vmem:[%s870_s14 + $0x28] sm:$0xff] %v426_v55  ;;  %554 = vst [vmem:[%s870_s14 + $0xa8] sm:$0xff] %v490_v56 }
 0x109   : > { %v707_v57 = vpop.f32.mrb[8].mxu0  ;;  %v723_v58 = vpop.f32.mrb[8].mxu1 }
 0x10a   : > { %v447_v59 = vadd.f32 %v707_v57, %v865_v24  ;;  %v511_v60 = vadd.f32 %v723_v58, %v865_v24  ;;  %v438_v61 = vpop.f32.mrb[9].mxu0  ;;  %v502_v62 = vpop.f32.mrb[9].mxu1 }
 0x10b   : > { %v439_v63 = vadd.f32 %v865_v24, %v438_v61  ;;  %v503_v0 = vadd.f32 %v865_v24, %v502_v62  ;;  %v708_v1 = vpop.f32.mrb[10].mxu0  ;;  %v724_v2 = vpop.f32.mrb[10].mxu1 }
 0x10c   : > { %543 = vst [vmem:[%s870_s14 + $0x50] sm:$0xff] %v447_v59  ;;  %559 = vst [vmem:[%s870_s14 + $0xd0] sm:$0xff] %v511_v60  ;;  %v450_v3 = vadd.f32 %v708_v1, %v865_v24  ;;  %v514_v4 = vadd.f32 %v724_v2, %v865_v24  ;;  %v441_v5 = vpop.f32.mrb[11].mxu0  ;;  %v505_v6 = vpop.f32.mrb[11].mxu1 }
 0x10d   : > { %541 = vst [vmem:[%s870_s14 + $0x40] sm:$0xff] %v439_v63  ;;  %557 = vst [vmem:[%s870_s14 + $0xc0] sm:$0xff] %v503_v0  ;;  %v442_v7 = vadd.f32 %v865_v24, %v441_v5  ;;  %v506_v8 = vadd.f32 %v865_v24, %v505_v6 }
 0x10e   : > { %544 = vst [vmem:[%s870_s14 + $0x58] sm:$0xff] %v450_v3  ;;  %560 = vst [vmem:[%s870_s14 + $0xd8] sm:$0xff] %v514_v4 }
 0x10f   : > { %542 = vst [vmem:[%s870_s14 + $0x48] sm:$0xff] %v442_v7  ;;  %558 = vst [vmem:[%s870_s14 + $0xc8] sm:$0xff] %v506_v8 }
 0x111   : > { %v711_v9 = vpop.f32.mrb[12].mxu0  ;;  %v727_v10 = vpop.f32.mrb[12].mxu1 }
 0x112   : > { %v463_v11 = vadd.f32 %v711_v9, %v865_v24  ;;  %v527_v12 = vadd.f32 %v727_v10, %v865_v24  ;;  %v454_v13 = vpop.f32.mrb[13].mxu0  ;;  %v518_v14 = vpop.f32.mrb[13].mxu1 }
 0x113   : > { %v455_v15 = vadd.f32 %v865_v24, %v454_v13  ;;  %v519_v16 = vadd.f32 %v865_v24, %v518_v14  ;;  %v712_v17 = vpop.f32.mrb[14].mxu0  ;;  %v728_v18 = vpop.f32.mrb[14].mxu1 }
 0x114   : > { %547 = vst [vmem:[%s870_s14 + $0x70] sm:$0xff] %v463_v11  ;;  %563 = vst [vmem:[%s870_s14 + $0xf0] sm:$0xff] %v527_v12  ;;  %v466_v19 = vadd.f32 %v712_v17, %v865_v24  ;;  %v530_v20 = vadd.f32 %v728_v18, %v865_v24  ;;  %v457_v21 = vpop.f32.mrb[15].mxu0  ;;  %v521_v22 = vpop.f32.mrb[15].mxu1 }
 0x115   : > { %545 = vst [vmem:[%s870_s14 + $0x60] sm:$0xff] %v455_v15  ;;  %561 = vst [vmem:[%s870_s14 + $0xe0] sm:$0xff] %v519_v16  ;;  %v458_v23 = vadd.f32 %v865_v24, %v457_v21  ;;  %v522_v25 = vadd.f32 %v865_v24, %v521_v22 }
 0x116   : > { %548 = vst [vmem:[%s870_s14 + $0x78] sm:$0xff] %v466_v19  ;;  %564 = vst [vmem:[%s870_s14 + $0xf8] sm:$0xff] %v530_v20 }
 0x117   : > { %546 = vst [vmem:[%s870_s14 + $0x68] sm:$0xff] %v458_v23  ;;  %562 = vst [vmem:[%s870_s14 + $0xe8] sm:$0xff] %v522_v25 }
 0x118 PF: > { %s13_s12 = sadd.s32 1, %s783_s12  }
 0x119   : > { %p10_p4 = scmp.ge.s32.totalorder %s13_s12, 4  }
 0x11b   :  { %12 = sbr.rel (!%p10_p4) target bundleno = 1 (0x1), region = 62 }

// kernel: mousenet_3d_forward.12
= control target key start
LH: loop header
LB: loop body
LE: loop exit
PB: predicated region body
PF: predicated region fallthrough
CT: control target
= control target key end

     0   :  { %s1074_s12 = smov 0   ;;  %s1251_s0 = inlined_call_operand.vmem [shape: bf16[512,256], index: 0, kind: input, shape index: {}]   ;;  %s1252_s1 = inlined_call_operand.vmem [shape: bf16[256,128], index: 1, kind: input, shape index: {}]   ;;  %s1253_s2 = inlined_call_operand.vmem [shape: f32[8,128], index: 2, kind: input, shape index: {}]   ;;  %s1254_s3 = inlined_call_operand.vmem [shape: f32[512,128], index: 3, kind: output, shape index: {}]  }
   0x1 LB: > { %s784_s13 = sadd.s32 4294967295, %s1052_s12   ;;  %p788_p0 = scmp.ge.s32.totalorder %s1052_s12, 1  ;;  %s1052_s12 = sphi %s1074_s12, %s13_s12  }
   0x2   : > { %p139_p1 = scmp.lt.s32.totalorder %s1052_s12, 3 }
   0x4   : > { %p140_p2 = pnand %p788_p0, %p139_p1 }
   0x5   : > { %v982_v0 = vld [vmem:[%s1252_s1 + $0x40] sm:$0xff] (!%p140_p2)   ;;  %s789_s16 = sshll.u32 (!%p140_p2), %s784_s13, 5  ;;  %v984_v2 = vld [vmem:[%s1252_s1 + $0x48] sm:$0xff] (!%p140_p2)   ;;  %v986_v4 = vld [vmem:[%s1252_s1 + $0x50] sm:$0xff] (!%p140_p2)  }
   0x6   : > { %143 = sbr.rel (%p140_p2) target bundleno = 316 (0x13c), region = 32  ;;  %v983_v1 = vld [vmem:[%s1252_s1] sm:$0xff] (!%p140_p2)   ;;  %846 = vmatprep.subr.bf16.mxu0 (!%p140_p2), %v982_v0  ;;  %958 = vmatprep.subr.bf16.mxu1 (!%p140_p2), %v982_v0  ;;  %v985_v3 = vld [vmem:[%s1252_s1 + $0x8] sm:$0xff] (!%p140_p2)   ;;  %p165_p3 = scmp.lt.s32.totalorder (!%p140_p2), %s789_s16, 63  ;;  %v987_v5 = vld [vmem:[%s1252_s1 + $0x10] sm:$0xff] (!%p140_p2)  }
   0x7   : > { %847 = vmatpush3.bf16.msra.mxu0 (!%p140_p2), %v983_v1  ;;  %966 = vmatpush3.bf16.msra.mxu1 (!%p140_p2), %v983_v1  ;;  %v988_v6 = vld [vmem:[%s1252_s1 + $0x58] sm:$0xff] (!%p140_p2)   ;;  %v990_v8 = vld [vmem:[%s1252_s1 + $0x60] sm:$0xff] (!%p140_p2)   ;;  %v992_v10 = vld [vmem:[%s1252_s1 + $0x68] sm:$0xff] (!%p140_p2)  }
   0x8   : > { %848 = vmatprep.subr.bf16.mxu0 (!%p140_p2), %v984_v2  ;;  %959 = vmatprep.subr.bf16.mxu1 (!%p140_p2), %v984_v2  ;;  %v989_v7 = vld [vmem:[%s1252_s1 + $0x18] sm:$0xff] (!%p140_p2)   ;;  %v991_v9 = vld [vmem:[%s1252_s1 + $0x20] sm:$0xff] (!%p140_p2)   ;;  %v993_v13 = vld [vmem:[%s1252_s1 + $0x28] sm:$0xff] (!%p140_p2)  }
   0x9   : > { %v994_v14 = vld [vmem:[%s1252_s1 + $0x70] sm:$0xff] (!%p140_p2)   ;;  %v996_v16 = vld [vmem:[%s1252_s1 + $0x78] sm:$0xff] (!%p140_p2)   ;;  %v1175_v50 = vld [vmem:[%s1253_s2] ss:$0 sm:$0xff] (!%p140_p2) }
   0xa   : > { %v995_v15 = vld [vmem:[%s1252_s1 + $0x30] sm:$0xff] (!%p140_p2)   ;;  %v997_v17 = vld [vmem:[%s1252_s1 + $0x38] sm:$0xff] (!%p140_p2)  }
   0xb   : > { %849 = vmatpush3.bf16.msra.mxu0 (!%p140_p2), %v985_v3  ;;  %967 = vmatpush3.bf16.msra.mxu1 (!%p140_p2), %v985_v3 }
   0xc   : > { %850 = vmatprep.subr.bf16.mxu0 (!%p140_p2), %v986_v4  ;;  %960 = vmatprep.subr.bf16.mxu1 (!%p140_p2), %v986_v4 }
   0xd   : > { %s1256_s16 = smov (!%p165_p3, %s789_s16), 63 }
   0xe   : > { %s845_s4 = sshll.u32 %s1256_s16, 3 }
   0xf   : > { %851 = vmatpush3.bf16.msra.mxu0 %v987_v5  ;;  %968 = vmatpush3.bf16.msra.mxu1 %v987_v5  ;;  %s1117_s9 = scalar_lea.vmem %s1251_s0, %s845_s4  ;;  %s1184_s30 = scalar_lea.vmem %s1254_s3, %s845_s4 }
  0x10   : > { %852 = vmatprep.subr.bf16.mxu0 %v988_v6  ;;  %961 = vmatprep.subr.bf16.mxu1 %v988_v6  ;;  %v1000_v11 = vld [vmem:[%s1117_s9 + $0x4] ss:$8 sps:$4 sm:$0xff]   ;;  %v998_v18 = vld [vmem:[%s1117_s9] ss:$8 sps:$4 sm:$0xff]   ;;  %v1004_v20 = vld [vmem:[%s1117_s9 + $0x14] ss:$8 sps:$4 sm:$0xff]  }
  0x11   : > { %v1003_v12 = vld [vmem:[%s1117_s9 + $0x84] ss:$8 sps:$4 sm:$0xff]   ;;  %535 = vmatprep.mubr.bf16.mxu0 %v1000_v11  ;;  %v1001_v19 = vld [vmem:[%s1117_s9 + $0x80] ss:$8 sps:$4 sm:$0xff]   ;;  %v1006_v21 = vld [vmem:[%s1117_s9 + $0x94] ss:$8 sps:$4 sm:$0xff]  }
  0x12   : > { %599 = vmatprep.mubr.bf16.mxu1 %v1003_v12  ;;  %v1008_v22 = vld [vmem:[%s1117_s9 + $0x10] ss:$8 sps:$4 sm:$0xff]   ;;  %v1010_v24 = vld [vmem:[%s1117_s9 + $0x24] ss:$8 sps:$4 sm:$0xff]   ;;  %v1014_v26 = vld [vmem:[%s1117_s9 + $0x20] ss:$8 sps:$4 sm:$0xff]  }
  0x13   : > { %853 = vmatpush3.bf16.msra.mxu0 %v989_v7  ;;  %969 = vmatpush3.bf16.msra.mxu1 %v989_v7  ;;  %v1009_v23 = vld [vmem:[%s1117_s9 + $0x90] ss:$8 sps:$4 sm:$0xff]   ;;  %v1012_v25 = vld [vmem:[%s1117_s9 + $0xa4] ss:$8 sps:$4 sm:$0xff]   ;;  %v1015_v27 = vld [vmem:[%s1117_s9 + $0xa0] ss:$8 sps:$4 sm:$0xff]  }
  0x14   : > { %854 = vmatprep.subr.bf16.mxu0 %v990_v8  ;;  %962 = vmatprep.subr.bf16.mxu1 %v990_v8  ;;  %v1016_v28 = vld [vmem:[%s1117_s9 + $0x34] ss:$8 sps:$4 sm:$0xff]   ;;  %v1020_v30 = vld [vmem:[%s1117_s9 + $0x30] ss:$8 sps:$4 sm:$0xff]   ;;  %v1022_v32 = vld [vmem:[%s1117_s9 + $0x44] ss:$8 sps:$4 sm:$0xff]  }
  0x15   : > { %v1018_v29 = vld [vmem:[%s1117_s9 + $0xb4] ss:$8 sps:$4 sm:$0xff]   ;;  %v1021_v31 = vld [vmem:[%s1117_s9 + $0xb0] ss:$8 sps:$4 sm:$0xff]   ;;  %v1024_v33 = vld [vmem:[%s1117_s9 + $0xc4] ss:$8 sps:$4 sm:$0xff]  }
  0x16   : > { %v1026_v34 = vld [vmem:[%s1117_s9 + $0x40] ss:$8 sps:$4 sm:$0xff]   ;;  %v1028_v36 = vld [vmem:[%s1117_s9 + $0x54] ss:$8 sps:$4 sm:$0xff]   ;;  %v1032_v38 = vld [vmem:[%s1117_s9 + $0x50] ss:$8 sps:$4 sm:$0xff]  }
  0x17   : > { %855 = vmatpush3.bf16.msra.mxu0 %v991_v9  ;;  %970 = vmatpush3.bf16.msra.mxu1 %v991_v9  ;;  %v1027_v35 = vld [vmem:[%s1117_s9 + $0xc0] ss:$8 sps:$4 sm:$0xff]   ;;  %v1030_v37 = vld [vmem:[%s1117_s9 + $0xd4] ss:$8 sps:$4 sm:$0xff]   ;;  %v1033_v39 = vld [vmem:[%s1117_s9 + $0xd0] ss:$8 sps:$4 sm:$0xff]  }
  0x18   : > { %856 = vmatprep.subr.bf16.mxu0 %v992_v10  ;;  %963 = vmatprep.subr.bf16.mxu1 %v992_v10  ;;  %v1034_v40 = vld [vmem:[%s1117_s9 + $0x64] ss:$8 sps:$4 sm:$0xff]   ;;  %v1038_v42 = vld [vmem:[%s1117_s9 + $0x60] ss:$8 sps:$4 sm:$0xff]   ;;  %v1040_v44 = vld [vmem:[%s1117_s9 + $0x74] ss:$8 sps:$4 sm:$0xff]  }
  0x19   : > { %v1036_v41 = vld [vmem:[%s1117_s9 + $0xe4] ss:$8 sps:$4 sm:$0xff]   ;;  %v1039_v43 = vld [vmem:[%s1117_s9 + $0xe0] ss:$8 sps:$4 sm:$0xff]   ;;  %v1042_v45 = vld [vmem:[%s1117_s9 + $0xf4] ss:$8 sps:$4 sm:$0xff]  }
  0x1a   : > { %v1044_v46 = vld [vmem:[%s1117_s9 + $0x70] ss:$8 sps:$4 sm:$0xff]  }
  0x1b   : > { %857 = vmatpush3.bf16.msra.mxu0 %v993_v13  ;;  %971 = vmatpush3.bf16.msra.mxu1 %v993_v13  ;;  %v1045_v47 = vld [vmem:[%s1117_s9 + $0xf0] ss:$8 sps:$4 sm:$0xff]  }
  0x1c   : > { %858 = vmatprep.subr.bf16.mxu0 %v994_v14  ;;  %964 = vmatprep.subr.bf16.mxu1 %v994_v14 }
  0x1f   : > { %859 = vmatpush3.bf16.msra.mxu0 %v995_v15  ;;  %972 = vmatpush3.bf16.msra.mxu1 %v995_v15 }
  0x20   : > { %860 = vmatprep.subr.bf16.mxu0 %v996_v16  ;;  %965 = vmatprep.subr.bf16.mxu1 %v996_v16 }
  0x23   : > { %861 = vmatpush3.bf16.msra.mxu0 %v997_v17  ;;  %973 = vmatpush3.bf16.msra.mxu1 %v997_v17 }
  0x26   : > { %536 = vmatmul.mubr.bf16.vlgmr.msra.gmra.mrb[0].mxu0 %v998_v18  ;;  %600 = vmatmul.mubr.bf16.vlgmr.msra.gmra.mrb[0].mxu1 %v1001_v19 }
  0x27   : > { %543 = vmatprep.mubr.bf16.mxu0 %v1004_v20  ;;  %607 = vmatprep.mubr.bf16.mxu1 %v1006_v21 }
  0x2e   : > { %544 = vmatmul.mubr.bf16.gmra.mrb[4].mxu0 %v1008_v22  ;;  %608 = vmatmul.mubr.bf16.gmra.mrb[4].mxu1 %v1009_v23 }
  0x2f   : > { %551 = vmatprep.mubr.bf16.mxu0 %v1010_v24  ;;  %615 = vmatprep.mubr.bf16.mxu1 %v1012_v25 }
  0x36   : > { %552 = vmatmul.mubr.bf16.gmra.mrb[8].mxu0 %v1014_v26  ;;  %616 = vmatmul.mubr.bf16.gmra.mrb[8].mxu1 %v1015_v27 }
  0x37   : > { %559 = vmatprep.mubr.bf16.mxu0 %v1016_v28  ;;  %623 = vmatprep.mubr.bf16.mxu1 %v1018_v29 }
  0x3e   : > { %560 = vmatmul.mubr.bf16.gmra.mrb[12].mxu0 %v1020_v30  ;;  %624 = vmatmul.mubr.bf16.gmra.mrb[12].mxu1 %v1021_v31 }
  0x3f   : > { %567 = vmatprep.mubr.bf16.mxu0 %v1022_v32  ;;  %631 = vmatprep.mubr.bf16.mxu1 %v1024_v33 }
  0x46   : > { %568 = vmatmul.mubr.bf16.gmra.mrb[16].mxu0 %v1026_v34  ;;  %632 = vmatmul.mubr.bf16.gmra.mrb[16].mxu1 %v1027_v35 }
  0x47   : > { %575 = vmatprep.mubr.bf16.mxu0 %v1028_v36  ;;  %639 = vmatprep.mubr.bf16.mxu1 %v1030_v37 }
  0x4e   : > { %576 = vmatmul.mubr.bf16.gmra.mrb[20].mxu0 %v1032_v38  ;;  %640 = vmatmul.mubr.bf16.gmra.mrb[20].mxu1 %v1033_v39 }
  0x4f   : > { %583 = vmatprep.mubr.bf16.mxu0 %v1034_v40  ;;  %647 = vmatprep.mubr.bf16.mxu1 %v1036_v41 }
  0x56   : > { %584 = vmatmul.mubr.bf16.gmra.mrb[24].mxu0 %v1038_v42  ;;  %648 = vmatmul.mubr.bf16.gmra.mrb[24].mxu1 %v1039_v43 }
  0x57   : > { %591 = vmatprep.mubr.bf16.mxu0 %v1040_v44  ;;  %655 = vmatprep.mubr.bf16.mxu1 %v1042_v45 }
  0x5e   : > { %592 = vmatmul.mubr.bf16.gmra.mrb[28].mxu0 %v1044_v46  ;;  %656 = vmatmul.mubr.bf16.gmra.mrb[28].mxu1 %v1045_v47 }
  0xf9   : > { %v862_v48 = vpop.f32.mrb[0].mxu0  ;;  %v910_v49 = vpop.f32.mrb[0].mxu1 }
  0xfa   : > { %v863_v51 = vpop.f32.mrb[1].mxu0  ;;  %v911_v52 = vpop.f32.mrb[1].mxu1 }
  0xfb   : > { %v864_v53 = vadd.f32 %v863_v51, %v862_v48  ;;  %v912_v54 = vadd.f32 %v911_v52, %v910_v49  ;;  %v865_v55 = vpop.f32.mrb[2].mxu0  ;;  %v913_v56 = vpop.f32.mrb[2].mxu1 }
  0xfc   : > { %v866_v57 = vpop.f32.mrb[3].mxu0  ;;  %v914_v58 = vpop.f32.mrb[3].mxu1 }
  0xfd   : > { %v538_v59 = vadd.f32 %v864_v53, %v1175_v50  ;;  %v602_v60 = vadd.f32 %v912_v54, %v1175_v50  ;;  %v867_v61 = vadd.f32 %v866_v57, %v865_v55  ;;  %v915_v62 = vadd.f32 %v914_v58, %v913_v56 }
  0xff   : > { %v664_v63 = vmax.f32 %v538_v59, 0.0  ;;  %v680_v0 = vmax.f32 %v602_v60, 0.0  ;;  %v541_v1 = vadd.f32 %v867_v61, %v1175_v50  ;;  %v605_v2 = vadd.f32 %v915_v62, %v1175_v50 }
 0x101   : > { %696 = vst [vmem:[%s1184_s30] sm:$0xff] %v664_v63  ;;  %712 = vst [vmem:[%s1184_s30 + $0x80] sm:$0xff] %v680_v0  ;;  %v665_v3 = vmax.f32 %v541_v1, 0.0  ;;  %v681_v4 = vmax.f32 %v605_v2, 0.0  ;;  %v868_v5 = vpop.f32.mrb[4].mxu0  ;;  %v916_v6 = vpop.f32.mrb[4].mxu1 }
 0x102   : > { %v869_v7 = vpop.f32.mrb[5].mxu0  ;;  %v917_v8 = vpop.f32.mrb[5].mxu1 }
 0x103   : > { %697 = vst [vmem:[%s1184_s30 + $0x8] sm:$0xff] %v665_v3  ;;  %713 = vst [vmem:[%s1184_s30 + $0x88] sm:$0xff] %v681_v4  ;;  %v870_v9 = vadd.f32 %v869_v7, %v868_v5  ;;  %v918_v10 = vadd.f32 %v917_v8, %v916_v6  ;;  %v871_v11 = vpop.f32.mrb[6].mxu0  ;;  %v919_v12 = vpop.f32.mrb[6].mxu1 }
 0x104   : > { %v872_v13 = vpop.f32.mrb[7].mxu0  ;;  %v920_v14 = vpop.f32.mrb[7].mxu1 }
 0x105   : > { %v546_v15 = vadd.f32 %v870_v9, %v1175_v50  ;;  %v610_v16 = vadd.f32 %v918_v10, %v1175_v50  ;;  %v873_v17 = vadd.f32 %v872_v13, %v871_v11  ;;  %v921_v18 = vadd.f32 %v920_v14, %v919_v12 }
 0x107   : > { %v666_v19 = vmax.f32 %v546_v15, 0.0  ;;  %v682_v20 = vmax.f32 %v610_v16, 0.0  ;;  %v549_v21 = vadd.f32 %v873_v17, %v1175_v50  ;;  %v613_v22 = vadd.f32 %v921_v18, %v1175_v50 }
 0x109   : > { %698 = vst [vmem:[%s1184_s30 + $0x10] sm:$0xff] %v666_v19  ;;  %714 = vst [vmem:[%s1184_s30 + $0x90] sm:$0xff] %v682_v20  ;;  %v667_v23 = vmax.f32 %v549_v21, 0.0  ;;  %v683_v24 = vmax.f32 %v613_v22, 0.0  ;;  %v874_v25 = vpop.f32.mrb[8].mxu0  ;;  %v922_v26 = vpop.f32.mrb[8].mxu1 }
 0x10a   : > { %v875_v27 = vpop.f32.mrb[9].mxu0  ;;  %v923_v28 = vpop.f32.mrb[9].mxu1 }
 0x10b   : > { %699 = vst [vmem:[%s1184_s30 + $0x18] sm:$0xff] %v667_v23  ;;  %715 = vst [vmem:[%s1184_s30 + $0x98] sm:$0xff] %v683_v24  ;;  %v876_v29 = vadd.f32 %v875_v27, %v874_v25  ;;  %v924_v30 = vadd.f32 %v923_v28, %v922_v26  ;;  %v877_v31 = vpop.f32.mrb[10].mxu0  ;;  %v925_v32 = vpop.f32.mrb[10].mxu1 }
 0x10c   : > { %v878_v33 = vpop.f32.mrb[11].mxu0  ;;  %v926_v34 = vpop.f32.mrb[11].mxu1 }
 0x10d   : > { %v554_v35 = vadd.f32 %v876_v29, %v1175_v50  ;;  %v618_v36 = vadd.f32 %v924_v30, %v1175_v50  ;;  %v879_v37 = vadd.f32 %v878_v33, %v877_v31  ;;  %v927_v38 = vadd.f32 %v926_v34, %v925_v32 }
 0x10f   : > { %v668_v39 = vmax.f32 %v554_v35, 0.0  ;;  %v684_v40 = vmax.f32 %v618_v36, 0.0  ;;  %v557_v41 = vadd.f32 %v879_v37, %v1175_v50  ;;  %v621_v42 = vadd.f32 %v927_v38, %v1175_v50 }
 0x111   : > { %700 = vst [vmem:[%s1184_s30 + $0x20] sm:$0xff] %v668_v39  ;;  %716 = vst [vmem:[%s1184_s30 + $0xa0] sm:$0xff] %v684_v40  ;;  %v669_v43 = vmax.f32 %v557_v41, 0.0  ;;  %v685_v44 = vmax.f32 %v621_v42, 0.0  ;;  %v880_v45 = vpop.f32.mrb[12].mxu0  ;;  %v928_v46 = vpop.f32.mrb[12].mxu1 }
 0x112   : > { %v881_v47 = vpop.f32.mrb[13].mxu0  ;;  %v929_v48 = vpop.f32.mrb[13].mxu1 }
 0x113   : > { %701 = vst [vmem:[%s1184_s30 + $0x28] sm:$0xff] %v669_v43  ;;  %717 = vst [vmem:[%s1184_s30 + $0xa8] sm:$0xff] %v685_v44  ;;  %v882_v49 = vadd.f32 %v881_v47, %v880_v45  ;;  %v930_v51 = vadd.f32 %v929_v48, %v928_v46  ;;  %v883_v52 = vpop.f32.mrb[14].mxu0  ;;  %v931_v53 = vpop.f32.mrb[14].mxu1 }
 0x114   : > { %v884_v54 = vpop.f32.mrb[15].mxu0  ;;  %v932_v55 = vpop.f32.mrb[15].mxu1 }
 0x115   : > { %v562_v56 = vadd.f32 %v882_v49, %v1175_v50  ;;  %v626_v57 = vadd.f32 %v930_v51, %v1175_v50  ;;  %v885_v58 = vadd.f32 %v884_v54, %v883_v52  ;;  %v933_v59 = vadd.f32 %v932_v55, %v931_v53 }
 0x117   : > { %v670_v60 = vmax.f32 %v562_v56, 0.0  ;;  %v686_v61 = vmax.f32 %v626_v57, 0.0  ;;  %v565_v62 = vadd.f32 %v885_v58, %v1175_v50  ;;  %v629_v63 = vadd.f32 %v933_v59, %v1175_v50 }
 0x119   : > { %702 = vst [vmem:[%s1184_s30 + $0x30] sm:$0xff] %v670_v60  ;;  %718 = vst [vmem:[%s1184_s30 + $0xb0] sm:$0xff] %v686_v61  ;;  %v671_v0 = vmax.f32 %v565_v62, 0.0  ;;  %v687_v1 = vmax.f32 %v629_v63, 0.0  ;;  %v886_v2 = vpop.f32.mrb[16].mxu0  ;;  %v934_v3 = vpop.f32.mrb[16].mxu1 }
 0x11a   : > { %v887_v4 = vpop.f32.mrb[17].mxu0  ;;  %v935_v5 = vpop.f32.mrb[17].mxu1 }
 0x11b   : > { %703 = vst [vmem:[%s1184_s30 + $0x38] sm:$0xff] %v671_v0  ;;  %719 = vst [vmem:[%s1184_s30 + $0xb8] sm:$0xff] %v687_v1  ;;  %v888_v6 = vadd.f32 %v887_v4, %v886_v2  ;;  %v936_v7 = vadd.f32 %v935_v5, %v934_v3  ;;  %v889_v8 = vpop.f32.mrb[18].mxu0  ;;  %v937_v9 = vpop.f32.mrb[18].mxu1 }
 0x11c   : > { %v890_v10 = vpop.f32.mrb[19].mxu0  ;;  %v938_v11 = vpop.f32.mrb[19].mxu1 }
 0x11d   : > { %v570_v12 = vadd.f32 %v888_v6, %v1175_v50  ;;  %v634_v13 = vadd.f32 %v936_v7, %v1175_v50  ;;  %v891_v14 = vadd.f32 %v890_v10, %v889_v8  ;;  %v939_v15 = vadd.f32 %v938_v11, %v937_v9 }
 0x11f   : > { %v672_v16 = vmax.f32 %v570_v12, 0.0  ;;  %v688_v17 = vmax.f32 %v634_v13, 0.0  ;;  %v573_v18 = vadd.f32 %v891_v14, %v1175_v50  ;;  %v637_v19 = vadd.f32 %v939_v15, %v1175_v50 }
 0x121   : > { %704 = vst [vmem:[%s1184_s30 + $0x40] sm:$0xff] %v672_v16  ;;  %720 = vst [vmem:[%s1184_s30 + $0xc0] sm:$0xff] %v688_v17  ;;  %v673_v20 = vmax.f32 %v573_v18, 0.0  ;;  %v689_v21 = vmax.f32 %v637_v19, 0.0  ;;  %v892_v22 = vpop.f32.mrb[20].mxu0  ;;  %v940_v23 = vpop.f32.mrb[20].mxu1 }
 0x122   : > { %v893_v24 = vpop.f32.mrb[21].mxu0  ;;  %v941_v25 = vpop.f32.mrb[21].mxu1 }
 0x123   : > { %705 = vst [vmem:[%s1184_s30 + $0x48] sm:$0xff] %v673_v20  ;;  %721 = vst [vmem:[%s1184_s30 + $0xc8] sm:$0xff] %v689_v21  ;;  %v894_v26 = vadd.f32 %v893_v24, %v892_v22  ;;  %v942_v27 = vadd.f32 %v941_v25, %v940_v23  ;;  %v895_v28 = vpop.f32.mrb[22].mxu0  ;;  %v943_v29 = vpop.f32.mrb[22].mxu1 }
 0x124   : > { %v896_v30 = vpop.f32.mrb[23].mxu0  ;;  %v944_v31 = vpop.f32.mrb[23].mxu1 }
 0x125   : > { %v578_v32 = vadd.f32 %v894_v26, %v1175_v50  ;;  %v642_v33 = vadd.f32 %v942_v27, %v1175_v50  ;;  %v897_v34 = vadd.f32 %v896_v30, %v895_v28  ;;  %v945_v35 = vadd.f32 %v944_v31, %v943_v29 }
 0x127   : > { %v674_v36 = vmax.f32 %v578_v32, 0.0  ;;  %v690_v37 = vmax.f32 %v642_v33, 0.0  ;;  %v581_v38 = vadd.f32 %v897_v34, %v1175_v50  ;;  %v645_v39 = vadd.f32 %v945_v35, %v1175_v50 }
 0x129   : > { %706 = vst [vmem:[%s1184_s30 + $0x50] sm:$0xff] %v674_v36  ;;  %722 = vst [vmem:[%s1184_s30 + $0xd0] sm:$0xff] %v690_v37  ;;  %v675_v40 = vmax.f32 %v581_v38, 0.0  ;;  %v691_v41 = vmax.f32 %v645_v39, 0.0  ;;  %v898_v42 = vpop.f32.mrb[24].mxu0  ;;  %v946_v43 = vpop.f32.mrb[24].mxu1 }
 0x12a   : > { %v899_v44 = vpop.f32.mrb[25].mxu0  ;;  %v947_v45 = vpop.f32.mrb[25].mxu1 }
 0x12b   : > { %707 = vst [vmem:[%s1184_s30 + $0x58] sm:$0xff] %v675_v40  ;;  %723 = vst [vmem:[%s1184_s30 + $0xd8] sm:$0xff] %v691_v41  ;;  %v900_v46 = vadd.f32 %v899_v44, %v898_v42  ;;  %v948_v47 = vadd.f32 %v947_v45, %v946_v43  ;;  %v901_v48 = vpop.f32.mrb[26].mxu0  ;;  %v949_v49 = vpop.f32.mrb[26].mxu1 }
 0x12c   : > { %v902_v51 = vpop.f32.mrb[27].mxu0  ;;  %v950_v52 = vpop.f32.mrb[27].mxu1 }
 0x12d   : > { %v586_v53 = vadd.f32 %v900_v46, %v1175_v50  ;;  %v650_v54 = vadd.f32 %v948_v47, %v1175_v50  ;;  %v903_v55 = vadd.f32 %v902_v51, %v901_v48  ;;  %v951_v56 = vadd.f32 %v950_v52, %v949_v49 }
 0x12f   : > { %v676_v57 = vmax.f32 %v586_v53, 0.0  ;;  %v692_v58 = vmax.f32 %v650_v54, 0.0  ;;  %v589_v59 = vadd.f32 %v903_v55, %v1175_v50  ;;  %v653_v60 = vadd.f32 %v951_v56, %v1175_v50 }
 0x131   : > { %708 = vst [vmem:[%s1184_s30 + $0x60] sm:$0xff] %v676_v57  ;;  %724 = vst [vmem:[%s1184_s30 + $0xe0] sm:$0xff] %v692_v58  ;;  %v677_v61 = vmax.f32 %v589_v59, 0.0  ;;  %v693_v62 = vmax.f32 %v653_v60, 0.0  ;;  %v904_v63 = vpop.f32.mrb[28].mxu0  ;;  %v952_v0 = vpop.f32.mrb[28].mxu1 }
 0x132   : > { %v905_v1 = vpop.f32.mrb[29].mxu0  ;;  %v953_v2 = vpop.f32.mrb[29].mxu1 }
 0x133   : > { %709 = vst [vmem:[%s1184_s30 + $0x68] sm:$0xff] %v677_v61  ;;  %725 = vst [vmem:[%s1184_s30 + $0xe8] sm:$0xff] %v693_v62  ;;  %v906_v3 = vadd.f32 %v905_v1, %v904_v63  ;;  %v954_v4 = vadd.f32 %v953_v2, %v952_v0  ;;  %v907_v5 = vpop.f32.mrb[30].mxu0  ;;  %v955_v6 = vpop.f32.mrb[30].mxu1 }
 0x134   : > { %v908_v7 = vpop.f32.mrb[31].mxu0  ;;  %v956_v8 = vpop.f32.mrb[31].mxu1 }
 0x135   : > { %v594_v9 = vadd.f32 %v906_v3, %v1175_v50  ;;  %v658_v10 = vadd.f32 %v954_v4, %v1175_v50  ;;  %v909_v11 = vadd.f32 %v908_v7, %v907_v5  ;;  %v957_v12 = vadd.f32 %v956_v8, %v955_v6 }
 0x137   : > { %v678_v13 = vmax.f32 %v594_v9, 0.0  ;;  %v694_v14 = vmax.f32 %v658_v10, 0.0  ;;  %v597_v15 = vadd.f32 %v909_v11, %v1175_v50  ;;  %v661_v16 = vadd.f32 %v957_v12, %v1175_v50 }
 0x139   : > { %710 = vst [vmem:[%s1184_s30 + $0x70] sm:$0xff] %v678_v13  ;;  %726 = vst [vmem:[%s1184_s30 + $0xf0] sm:$0xff] %v694_v14  ;;  %v679_v17 = vmax.f32 %v597_v15, 0.0  ;;  %v695_v18 = vmax.f32 %v661_v16, 0.0 }
 0x13b   : > { %711 = vst [vmem:[%s1184_s30 + $0x78] sm:$0xff] %v679_v17  ;;  %727 = vst [vmem:[%s1184_s30 + $0xf8] sm:$0xff] %v695_v18 }
 0x13c PF: > { %s13_s12 = sadd.s32 1, %s1052_s12  }
 0x13d   : > { %p10_p4 = scmp.ge.s32.totalorder %s13_s12, 4  }
 0x13f   :  { %12 = sbr.rel (!%p10_p4) target bundleno = 1 (0x1), region = 62 }

</bundles_post_ra>
